<compile_context>
chip_gen: v6e
topology: v6e:2x2x1
jax: 0.10.0
libtpu: 0.0.40
codegen_flags: <defaults>
</compile_context>

<pallas_src>
import functools
import math

import jax
import jax.numpy as jnp
from jax.experimental import pallas as pl
from jax.experimental.pallas import tpu as pltpu


# ------------------------------ tiling helper ------------------------------ #

def _tile(dim, target, align):
    """Largest block <= target that divides dim and is a multiple of align
    (or the full dim if dim <= target / no aligned divisor exists)."""
    if dim <= target:
        return dim
    t = (target // align) * align
    while t >= align:
        if dim % t == 0:
            return t
        t -= align
    return dim


_VMEM_LIMIT = 48 * 1024 * 1024  # fits v7x's 64 MiB physical VMEM with headroom


def _gelu(y):
    # tanh-approx GELU (HF uses erf GELU; difference is negligible here)
    c = math.sqrt(2.0 / math.pi)
    return 0.5 * y * (1.0 + jnp.tanh(c * (y + 0.044715 * y * y * y)))


# ------------------------- tiled linear (+ GELU) --------------------------- #

def _linear_fullk_kernel(x_ref, w_ref, b_ref, o_ref, *, activation):
    # full-K block: one MXU pass, no accumulator scratch
    y = jnp.dot(x_ref[...], w_ref[...], preferred_element_type=jnp.float32)
    y = y + b_ref[...]
    if activation == "gelu":
        y = _gelu(y)
    o_ref[...] = y.astype(o_ref.dtype)


def _linear_ktiled_kernel(x_ref, w_ref, b_ref, o_ref, acc_ref, *, activation):
    k = pl.program_id(2)

    @pl.when(k == 0)
    def _():
        acc_ref[...] = jnp.zeros_like(acc_ref)

    acc_ref[...] += jnp.dot(x_ref[...], w_ref[...],
                            preferred_element_type=jnp.float32)

    @pl.when(k == pl.num_programs(2) - 1)
    def _():
        y = acc_ref[...] + b_ref[...]
        if activation == "gelu":
            y = _gelu(y)
        o_ref[...] = y.astype(o_ref.dtype)


def pallas_linear(x, w, b, activation=None, *, tm=512, tn=768):
    """bf16 x @ bf16 w + f32 b (+ optional GELU) -> bf16, f32 accumulation."""
    M, K = x.shape
    N = w.shape[1]
    tm = _tile(M, tm, 8)
    tn = _tile(N, tn, 128)
    assert M % tm == 0 and N % tn == 0, (M, tm, N, tn)
    b2 = b.reshape(1, N).astype(jnp.float32)

    if K <= 1024:
        return pl.pallas_call(
            functools.partial(_linear_fullk_kernel, activation=activation),
            grid=(M // tm, N // tn),
            in_specs=[pl.BlockSpec((tm, K), lambda i, j: (i, 0)),
                      pl.BlockSpec((K, tn), lambda i, j: (0, j)),
                      pl.BlockSpec((1, tn), lambda i, j: (0, j))],
            out_specs=pl.BlockSpec((tm, tn), lambda i, j: (i, j)),
            out_shape=jax.ShapeDtypeStruct((M, N), jnp.bfloat16),
            compiler_params=pltpu.CompilerParams(
                dimension_semantics=("parallel", "parallel"),
                vmem_limit_bytes=_VMEM_LIMIT),
        )(x, w, b2)

    tk = _tile(K, 1024, 256)
    assert K % tk == 0, (K, tk)
    return pl.pallas_call(
        functools.partial(_linear_ktiled_kernel, activation=activation),
        grid=(M // tm, N // tn, K // tk),
        in_specs=[pl.BlockSpec((tm, tk), lambda i, j, k: (i, k)),
                  pl.BlockSpec((tk, tn), lambda i, j, k: (k, j)),
                  pl.BlockSpec((1, tn), lambda i, j, k: (0, j))],
        out_specs=pl.BlockSpec((tm, tn), lambda i, j, k: (i, j)),
        out_shape=jax.ShapeDtypeStruct((M, N), jnp.bfloat16),
        scratch_shapes=[pltpu.VMEM((tm, tn), jnp.float32)],
        compiler_params=pltpu.CompilerParams(
            dimension_semantics=("parallel", "parallel", "arbitrary"),
            vmem_limit_bytes=_VMEM_LIMIT),
    )(x, w, b2)


# ----------------- tiled linear + residual-add + LayerNorm ----------------- #

def _linear_res_ln_fullk_kernel(x_ref, w_ref, b_ref, res_ref, g_ref, beta_ref,
                                o_ref, *, eps):
    y = jnp.dot(x_ref[...], w_ref[...], preferred_element_type=jnp.float32)
    y = y + b_ref[...] + res_ref[...].astype(jnp.float32)
    mu = jnp.mean(y, axis=-1, keepdims=True)
    var = jnp.mean(jnp.square(y - mu), axis=-1, keepdims=True)
    y = (y - mu) * jax.lax.rsqrt(var + eps)
    o_ref[...] = (y * g_ref[...] + beta_ref[...]).astype(o_ref.dtype)


def _linear_res_ln_ktiled_kernel(x_ref, w_ref, b_ref, res_ref, g_ref, beta_ref,
                                 o_ref, acc_ref, *, eps):
    k = pl.program_id(1)

    @pl.when(k == 0)
    def _():
        acc_ref[...] = jnp.zeros_like(acc_ref)

    acc_ref[...] += jnp.dot(x_ref[...], w_ref[...],
                            preferred_element_type=jnp.float32)

    @pl.when(k == pl.num_programs(1) - 1)
    def _():
        y = acc_ref[...] + b_ref[...] + res_ref[...].astype(jnp.float32)
        mu = jnp.mean(y, axis=-1, keepdims=True)
        var = jnp.mean(jnp.square(y - mu), axis=-1, keepdims=True)
        y = (y - mu) * jax.lax.rsqrt(var + eps)
        o_ref[...] = (y * g_ref[...] + beta_ref[...]).astype(o_ref.dtype)


def pallas_linear_res_ln(x, w, b, res, gamma, beta, *, eps=1e-5, tm=512):
    """out = LayerNorm(x @ w + b + res) in bf16; the block keeps the full N so the
    lane-axis LN reduction is complete inside the kernel."""
    M, K = x.shape
    N = w.shape[1]
    tm = _tile(M, tm, 8)
    assert M % tm == 0, (M, tm)
    b2 = b.reshape(1, N).astype(jnp.float32)
    g2 = gamma.reshape(1, N).astype(jnp.float32)
    be2 = beta.reshape(1, N).astype(jnp.float32)

    if K <= 1024:
        return pl.pallas_call(
            functools.partial(_linear_res_ln_fullk_kernel, eps=eps),
            grid=(M // tm,),
            in_specs=[pl.BlockSpec((tm, K), lambda i: (i, 0)),
                      pl.BlockSpec((K, N), lambda i: (0, 0)),
                      pl.BlockSpec((1, N), lambda i: (0, 0)),
                      pl.BlockSpec((tm, N), lambda i: (i, 0)),
                      pl.BlockSpec((1, N), lambda i: (0, 0)),
                      pl.BlockSpec((1, N), lambda i: (0, 0))],
            out_specs=pl.BlockSpec((tm, N), lambda i: (i, 0)),
            out_shape=jax.ShapeDtypeStruct((M, N), jnp.bfloat16),
            compiler_params=pltpu.CompilerParams(
                dimension_semantics=("parallel",),
                vmem_limit_bytes=_VMEM_LIMIT),
        )(x, w, b2, res, g2, be2)

    tk = _tile(K, 1024, 256)
    assert K % tk == 0, (K, tk)
    return pl.pallas_call(
        functools.partial(_linear_res_ln_ktiled_kernel, eps=eps),
        grid=(M // tm, K // tk),
        in_specs=[pl.BlockSpec((tm, tk), lambda i, k: (i, k)),
                  pl.BlockSpec((tk, N), lambda i, k: (k, 0)),
                  pl.BlockSpec((1, N), lambda i, k: (0, 0)),
                  pl.BlockSpec((tm, N), lambda i, k: (i, 0)),
                  pl.BlockSpec((1, N), lambda i, k: (0, 0)),
                  pl.BlockSpec((1, N), lambda i, k: (0, 0))],
        out_specs=pl.BlockSpec((tm, N), lambda i, k: (i, 0)),
        out_shape=jax.ShapeDtypeStruct((M, N), jnp.bfloat16),
        scratch_shapes=[pltpu.VMEM((tm, N), jnp.float32)],
        compiler_params=pltpu.CompilerParams(
            dimension_semantics=("parallel", "arbitrary"),
            vmem_limit_bytes=_VMEM_LIMIT),
    )(x, w, b2, res, g2, be2)


# ------------- embedding: fused pos/type add + LayerNorm kernel ------------ #

def _emb_ln_kernel(wrd_ref, pos_ref, typ_ref, g_ref, b_ref, o_ref, *, eps):
    x = (wrd_ref[0].astype(jnp.float32)
         + pos_ref[...].astype(jnp.float32)
         + typ_ref[...].astype(jnp.float32))
    mu = jnp.mean(x, axis=-1, keepdims=True)
    var = jnp.mean(jnp.square(x - mu), axis=-1, keepdims=True)
    y = (x - mu) * jax.lax.rsqrt(var + eps)
    o_ref[0] = (y * g_ref[...] + b_ref[...]).astype(o_ref.dtype)


def pallas_embed_ln(word_gathered, pos_emb, type_row, gamma, beta,
                    *, eps=1e-5, ts=256):
    """LayerNorm(word + pos + type) with the adds fused into the LN kernel."""
    B, S, H = word_gathered.shape
    ts = _tile(S, ts, 8)
    assert S % ts == 0, (S, ts)
    g2 = gamma.reshape(1, H).astype(jnp.float32)
    b2 = beta.reshape(1, H).astype(jnp.float32)
    return pl.pallas_call(
        functools.partial(_emb_ln_kernel, eps=eps),
        grid=(B, S // ts),
        in_specs=[pl.BlockSpec((1, ts, H), lambda b, s: (b, s, 0)),
                  pl.BlockSpec((ts, H), lambda b, s: (s, 0)),
                  pl.BlockSpec((1, H), lambda b, s: (0, 0)),
                  pl.BlockSpec((1, H), lambda b, s: (0, 0)),
                  pl.BlockSpec((1, H), lambda b, s: (0, 0))],
        out_specs=pl.BlockSpec((1, ts, H), lambda b, s: (b, s, 0)),
        out_shape=jax.ShapeDtypeStruct((B, S, H), jnp.bfloat16),
        compiler_params=pltpu.CompilerParams(
            dimension_semantics=("parallel", "parallel")),
    )(word_gathered, pos_emb, type_row, g2, b2)


# ------------------------------- attention --------------------------------- #

def _attention_kernel(q_ref, k_ref, v_ref, mb_ref, o_ref,
                      *, heads_per_group, head_dim, scale):
    """One (batch, head-group) grid point: softmax(q k^T * scale + mask) v for
    a 128-lane-wide group of heads; output stored once, lane-dense."""
    q = q_ref[0]                      # (S, GW) bf16
    k = k_ref[0]                      # (S, GW) bf16
    v = v_ref[0]                      # (S, GW) bf16
    mb = mb_ref[0]                    # (1, S)  f32 additive mask bias
    dn = (((1,), (1,)), ((), ()))     # contract head_dim directly, no k.T copy
    outs = []
    for h in range(heads_per_group):
        sl = slice(h * head_dim, (h + 1) * head_dim)
        s = jax.lax.dot_general(q[:, sl], k[:, sl], dn,
                                preferred_element_type=jnp.float32)   # (S, S)
        s = s * scale + mb
        m = jnp.max(s, axis=-1, keepdims=True)
        p = jnp.exp(s - m)
        p = p * pl.reciprocal(jnp.sum(p, axis=-1, keepdims=True), approx=True)
        outs.append(jnp.dot(p.astype(v.dtype), v[:, sl],
                            preferred_element_type=jnp.float32))
    o_ref[0] = jnp.concatenate(outs, axis=-1).astype(o_ref.dtype)


def pallas_attention(qkv, mask_bias, *, num_heads):
    # qkv: (B, S, 3H) fused projection (bf16); mask_bias: (B, 1, S) additive f32.
    B, S, H3 = qkv.shape
    H = H3 // 3
    D = H // num_heads
    # Head-group size so the per-group lane width is a multiple of 128 (lane-dense
    # stores + more grid points for the v7x megacore split).
    if D % 128 == 0:
        g = 1
    elif 128 % D == 0 and num_heads % (128 // D) == 0:
        g = 128 // D
    else:
        g = num_heads
    gw = g * D
    assert gw % 128 == 0, "head-group lane width must be a multiple of 128"
    assert H % gw == 0
    ngroups = num_heads // g
    koff = H // gw            # block offset of K slab within the 3H axis (GW units)
    voff = 2 * H // gw        # block offset of V slab
    scale = 1.0 / math.sqrt(D)
    return pl.pallas_call(
        functools.partial(_attention_kernel, heads_per_group=g,
                          head_dim=D, scale=scale),
        grid=(B, ngroups),
        in_specs=[pl.BlockSpec((1, S, gw), lambda b, hg: (b, 0, hg)),
                  pl.BlockSpec((1, S, gw), lambda b, hg: (b, 0, koff + hg)),
                  pl.BlockSpec((1, S, gw), lambda b, hg: (b, 0, voff + hg)),
                  pl.BlockSpec((1, 1, S), lambda b, hg: (b, 0, 0))],
        out_specs=pl.BlockSpec((1, S, gw), lambda b, hg: (b, 0, hg)),
        out_shape=jax.ShapeDtypeStruct((B, S, H), jnp.bfloat16),
        compiler_params=pltpu.CompilerParams(
            dimension_semantics=("parallel", "parallel"),
            vmem_limit_bytes=_VMEM_LIMIT),
    )(qkv, qkv, qkv, mask_bias)


# --------------------------- classification heads -------------------------- #
# Per the perf review: the 3-wide heads are pure launch/DMA overhead as a Pallas
# call, so they run in plain JAX (tiny matmuls).

def rep_heads(h, index_mask, w_cat, b_cat, w_mask, b_mask):
    hf = h.astype(jnp.float32)
    cls_h = hf[:, 0, :]                                            # (B, H)
    mask_h = jnp.einsum('bs,bsh->bh', index_mask.astype(jnp.float32), hf)
    cat = jnp.concatenate([cls_h, mask_h], axis=-1)                # (B, 2H)
    linear_cat = cat @ w_cat + b_cat
    linear_mask = mask_h @ w_mask + b_mask
    return linear_cat, linear_mask


# ------------------------------- model glue -------------------------------- #

def roberta_encode(params, input_ids, attention_mask, cfg):
    B, S = input_ids.shape
    H, NH = cfg["hidden"], cfg["heads"]

    # word-id gather stays in plain JAX (bf16); pos/type adds fused into the LN kernel
    word = params["word_emb"][input_ids]                  # (B, S, H) bf16
    pos = params["pos_emb"][:S]                           # (S, H) bf16
    x = pallas_embed_ln(word, pos, params["type_emb"],
                        params["emb_ln_g"], params["emb_ln_b"])
    x = x.reshape(B * S, H)

    mask_bias = ((1.0 - attention_mask.astype(jnp.float32)) * -1e9).reshape(B, 1, S)

    for lyr in params["layers"]:
        # fused Q/K/V projection -> (B*S, 3H) bf16
        qkv = pallas_linear(x, lyr["wqkv"], lyr["bqkv"])
        attn = pallas_attention(qkv.reshape(B, S, 3 * H), mask_bias, num_heads=NH)
        # output projection + residual add + LayerNorm fused in one kernel
        x = pallas_linear_res_ln(attn.reshape(B * S, H), lyr["wo"], lyr["bo"],
                                 x, lyr["attn_ln_g"], lyr["attn_ln_b"])
        ffn = pallas_linear(x, lyr["w1"], lyr["b1"], activation="gelu")
        x = pallas_linear_res_ln(ffn, lyr["w2"], lyr["b2"],
                                 x, lyr["ffn_ln_g"], lyr["ffn_ln_b"])

    return x.reshape(B, S, H)


def roberta_cor_forward(params, input_ids, attention_mask, input_ids1,
                        attention_mask1, index_mask, index_mask1, *, cfg):
    # branch 0
    h = roberta_encode(params, input_ids, attention_mask, cfg)
    # dropout(p=0.1) -> identity at eval
    linear_output, linear_output3 = rep_heads(
        h, index_mask, params["dense_w"], params["dense_b"],
        params["dense2_w"], params["dense2_b"])
    # branch 1
    h1 = roberta_encode(params, input_ids1, attention_mask1, cfg)
    linear_output1, linear_output4 = rep_heads(
        h1, index_mask1, params["dense1_w"], params["dense1_b"],
        params["dense3_w"], params["dense3_b"])
    return linear_output, linear_output1, linear_output3, linear_output4


def init_params(key, cfg):
    # TODO(synk): pretrained roberta-base weights cannot be loaded in-script;
    # deterministic random init with the same structure is used instead.
    keys = iter(jax.random.split(key, 256))

    def nrm(shape, std=0.02, dtype=jnp.bfloat16):
        return (std * jax.random.normal(next(keys), shape, dtype=jnp.float32)
                ).astype(dtype)

    H, I = cfg["hidden"], cfg["intermediate"]
    params = dict(
        # streamed weights are bf16; biases / LN params stay f32
        word_emb=nrm((cfg["vocab"], H)),
        pos_emb=nrm((cfg["max_pos"], H)),
        type_emb=nrm((1, H)),
        emb_ln_g=jnp.ones((H,), jnp.float32),
        emb_ln_b=jnp.zeros((H,), jnp.float32),
        layers=[],
        # heads: dense/dense1 take cat([cls, mask]) (2H), dense2/dense3 take mask rep (H)
        dense_w=nrm((2 * H, 3), dtype=jnp.float32),
        dense_b=jnp.zeros((3,), jnp.float32),
        dense1_w=nrm((2 * H, 3), dtype=jnp.float32),
        dense1_b=jnp.zeros((3,), jnp.float32),
        dense2_w=nrm((H, 3), dtype=jnp.float32),
        dense2_b=jnp.zeros((3,), jnp.float32),
        dense3_w=nrm((H, 3), dtype=jnp.float32),
        dense3_b=jnp.zeros((3,), jnp.float32),
    )
    for _ in range(cfg["layers"]):
        params["layers"].append(dict(
            wqkv=nrm((H, 3 * H)), bqkv=jnp.zeros((3 * H,), jnp.float32),
            wo=nrm((H, H)), bo=jnp.zeros((H,), jnp.float32),
            attn_ln_g=jnp.ones((H,), jnp.float32),
            attn_ln_b=jnp.zeros((H,), jnp.float32),
            w1=nrm((H, I)), b1=jnp.zeros((I,), jnp.float32),
            w2=nrm((I, H)), b2=jnp.zeros((H,), jnp.float32),
            ffn_ln_g=jnp.ones((H,), jnp.float32),
            ffn_ln_b=jnp.zeros((H,), jnp.float32),
        ))
    return params


if __name__ == "__main__":
    # small RoBERTa-style config (real roberta-base: H=768, 12 layers, 12 heads)
    cfg = dict(vocab=64, max_pos=64, hidden=128, heads=4, intermediate=256, layers=2)
    B, S = 2, 16

    key = jax.random.PRNGKey(0)
    pkey, k1, k2, k3, k4 = jax.random.split(key, 5)
    params = init_params(pkey, cfg)

    input_ids = jax.random.randint(k1, (B, S), 0, cfg["vocab"], dtype=jnp.int32)
    input_ids1 = jax.random.randint(k2, (B, S), 0, cfg["vocab"], dtype=jnp.int32)
    attention_mask = jnp.ones((B, S), jnp.int32)
    attention_mask1 = jnp.ones((B, S), jnp.int32)
    # index_mask: one-hot over the sequence marking the <mask> token position
    mask_pos = jax.random.randint(k3, (B,), 1, S)
    mask_pos1 = jax.random.randint(k4, (B,), 1, S)
    index_mask = jax.nn.one_hot(mask_pos, S, dtype=jnp.float32)
    index_mask1 = jax.nn.one_hot(mask_pos1, S, dtype=jnp.float32)

    fwd = jax.jit(functools.partial(roberta_cor_forward, cfg=cfg))
    outs = fwd(params, input_ids, attention_mask, input_ids1, attention_mask1,
               index_mask, index_mask1)
    outs = jax.block_until_ready(outs)

    assert all(o.shape == (B, 3) for o in outs)
    assert all(bool(jnp.all(jnp.isfinite(o))) for o in outs)
    print("KERNEL_OK")
</pallas_src>

<mosaic_0001>
module attributes {stable_mosaic.version = 11 : i64} {
  func.func @_emb_ln_kernel(%arg0: i32, %arg1: i32, %arg2: memref<1x16x128xbf16, #tpu.memory_space<vmem>>, %arg3: memref<16x128xbf16, #tpu.memory_space<vmem>>, %arg4: memref<1x128xbf16, #tpu.memory_space<vmem>>, %arg5: memref<1x128xf32, #tpu.memory_space<vmem>>, %arg6: memref<1x128xf32, #tpu.memory_space<vmem>>, %arg7: memref<1x16x128xbf16, #tpu.memory_space<vmem>>) attributes {dimension_semantics = [#tpu.dimension_semantics<parallel>, #tpu.dimension_semantics<parallel>], iteration_bounds = array<i64: 2, 1>, scalar_prefetch = 0 : i64, scratch_operands = 0 : i64, tpu.core_type = #tpu.core_type<tc>, window_params = [{transform_indices = @transform_0, window_bounds = array<i64: 1, 16, 128>}, {transform_indices = @transform_1, window_bounds = array<i64: 16, 128>}, {pipeline_mode = #tpu.pipeline_mode<synchronous>, transform_indices = @transform_2, window_bounds = array<i64: 1, 128>}, {pipeline_mode = #tpu.pipeline_mode<synchronous>, transform_indices = @transform_3, window_bounds = array<i64: 1, 128>}, {pipeline_mode = #tpu.pipeline_mode<synchronous>, transform_indices = @transform_4, window_bounds = array<i64: 1, 128>}, {transform_indices = @transform_5, window_bounds = array<i64: 1, 16, 128>}]} {
    %c0 = arith.constant 0 : index
    %c0_0 = arith.constant 0 : index
    %c0_1 = arith.constant 0 : index
    %0 = vector.load %arg2[%c0, %c0_0, %c0_1] : memref<1x16x128xbf16, #tpu.memory_space<vmem>>, vector<1x16x128xbf16>
    %1 = vector.shape_cast %0 : vector<1x16x128xbf16> to vector<16x128xbf16>
    %2 = arith.extf %1 : vector<16x128xbf16> to vector<16x128xf32>
    %c0_2 = arith.constant 0 : index
    %c0_3 = arith.constant 0 : index
    %3 = vector.load %arg3[%c0_2, %c0_3] : memref<16x128xbf16, #tpu.memory_space<vmem>>, vector<16x128xbf16>
    %4 = arith.extf %3 : vector<16x128xbf16> to vector<16x128xf32>
    %5 = arith.addf %2, %4 : vector<16x128xf32>
    %c0_4 = arith.constant 0 : index
    %c0_5 = arith.constant 0 : index
    %6 = vector.load %arg4[%c0_4, %c0_5] : memref<1x128xbf16, #tpu.memory_space<vmem>>, vector<1x128xbf16>
    %7 = arith.extf %6 : vector<1x128xbf16> to vector<1x128xf32>
    %8 = vector.broadcast %7 : vector<1x128xf32> to vector<16x128xf32>
    %9 = arith.addf %5, %8 : vector<16x128xf32>
    %cst = arith.constant dense<0.000000e+00> : vector<16xf32>
    %10 = vector.multi_reduction <add>, %9, %cst [1] : vector<16x128xf32> to vector<16xf32>
    %11 = vector.shape_cast %10 : vector<16xf32> to vector<16x1xf32>
    %cst_6 = arith.constant 1.280000e+02 : f32
    %12 = vector.broadcast %cst_6 : f32 to vector<16x1xf32>
    %13 = arith.divf %11, %12 : vector<16x1xf32>
    %14 = vector.broadcast %13 : vector<16x1xf32> to vector<16x128xf32>
    %15 = arith.subf %9, %14 : vector<16x128xf32>
    %16 = arith.mulf %15, %15 : vector<16x128xf32>
    %cst_7 = arith.constant dense<0.000000e+00> : vector<16xf32>
    %17 = vector.multi_reduction <add>, %16, %cst_7 [1] : vector<16x128xf32> to vector<16xf32>
    %18 = vector.shape_cast %17 : vector<16xf32> to vector<16x1xf32>
    %cst_8 = arith.constant 1.280000e+02 : f32
    %19 = vector.broadcast %cst_8 : f32 to vector<16x1xf32>
    %20 = arith.divf %18, %19 : vector<16x1xf32>
    %21 = vector.broadcast %13 : vector<16x1xf32> to vector<16x128xf32>
    %22 = arith.subf %9, %21 : vector<16x128xf32>
    %cst_9 = arith.constant 9.99999974E-6 : f32
    %23 = vector.broadcast %cst_9 : f32 to vector<16x1xf32>
    %24 = arith.addf %20, %23 : vector<16x1xf32>
    %25 = math.rsqrt %24 : vector<16x1xf32>
    %26 = vector.broadcast %25 : vector<16x1xf32> to vector<16x128xf32>
    %27 = arith.mulf %22, %26 : vector<16x128xf32>
    %c0_10 = arith.constant 0 : index
    %c0_11 = arith.constant 0 : index
    %28 = vector.load %arg5[%c0_10, %c0_11] : memref<1x128xf32, #tpu.memory_space<vmem>>, vector<1x128xf32>
    %29 = vector.broadcast %28 : vector<1x128xf32> to vector<16x128xf32>
    %30 = arith.mulf %27, %29 : vector<16x128xf32>
    %c0_12 = arith.constant 0 : index
    %c0_13 = arith.constant 0 : index
    %31 = vector.load %arg6[%c0_12, %c0_13] : memref<1x128xf32, #tpu.memory_space<vmem>>, vector<1x128xf32>
    %32 = vector.broadcast %31 : vector<1x128xf32> to vector<16x128xf32>
    %33 = arith.addf %30, %32 : vector<16x128xf32>
    %34 = arith.truncf %33 : vector<16x128xf32> to vector<16x128xbf16>
    %c0_14 = arith.constant 0 : index
    %c0_15 = arith.constant 0 : index
    %c0_16 = arith.constant 0 : index
    %35 = vector.load %arg7[%c0_14, %c0_15, %c0_16] : memref<1x16x128xbf16, #tpu.memory_space<vmem>>, vector<1x16x128xbf16>
    %36 = vector.shape_cast %35 : vector<1x16x128xbf16> to vector<16x128xbf16>
    %37 = vector.shape_cast %34 : vector<16x128xbf16> to vector<1x16x128xbf16>
    tpu.vector_store %arg7[%c0_14, %c0_15, %c0_16], %37 {strides = array<i32>} : memref<1x16x128xbf16, #tpu.memory_space<vmem>>, vector<1x16x128xbf16>,
    return
  }
  func.func @transform_0(%arg0: i32, %arg1: i32) -> (i32, i32, i32) {
    %c0_i32 = arith.constant 0 : i32
    %c0_i32_0 = arith.constant 0 : i32
    return %arg0, %arg1, %c0_i32 : i32, i32, i32
  }
  func.func @transform_1(%arg0: i32, %arg1: i32) -> (i32, i32) {
    %c0_i32 = arith.constant 0 : i32
    %c0_i32_0 = arith.constant 0 : i32
    return %arg1, %c0_i32 : i32, i32
  }
  func.func @transform_2(%arg0: i32, %arg1: i32) -> (i32, i32) {
    %c0_i32 = arith.constant 0 : i32
    %c0_i32_0 = arith.constant 0 : i32
    %c0_i32_1 = arith.constant 0 : i32
    return %c0_i32, %c0_i32_0 : i32, i32
  }
  func.func @transform_3(%arg0: i32, %arg1: i32) -> (i32, i32) {
    %c0_i32 = arith.constant 0 : i32
    %c0_i32_0 = arith.constant 0 : i32
    %c0_i32_1 = arith.constant 0 : i32
    return %c0_i32, %c0_i32_0 : i32, i32
  }
  func.func @transform_4(%arg0: i32, %arg1: i32) -> (i32, i32) {
    %c0_i32 = arith.constant 0 : i32
    %c0_i32_0 = arith.constant 0 : i32
    %c0_i32_1 = arith.constant 0 : i32
    return %c0_i32, %c0_i32_0 : i32, i32
  }
  func.func @transform_5(%arg0: i32, %arg1: i32) -> (i32, i32, i32) {
    %c0_i32 = arith.constant 0 : i32
    %c0_i32_0 = arith.constant 0 : i32
    return %arg0, %arg1, %c0_i32 : i32, i32, i32
  }
}

module attributes {stable_mosaic.version = 11 : i64} {
  func.func @_linear_fullk_kernel(%arg0: i32, %arg1: i32, %arg2: memref<32x128xbf16, #tpu.memory_space<vmem>>, %arg3: memref<128x384xbf16, #tpu.memory_space<vmem>>, %arg4: memref<1x384xf32, #tpu.memory_space<vmem>>, %arg5: memref<32x384xbf16, #tpu.memory_space<vmem>>) attributes {dimension_semantics = [#tpu.dimension_semantics<parallel>, #tpu.dimension_semantics<parallel>], iteration_bounds = array<i64: 1, 1>, scalar_prefetch = 0 : i64, scratch_operands = 0 : i64, tpu.core_type = #tpu.core_type<tc>, window_params = [{transform_indices = @transform_0, window_bounds = array<i64: 32, 128>}, {transform_indices = @transform_1, window_bounds = array<i64: 128, 384>}, {transform_indices = @transform_2, window_bounds = array<i64: 1, 384>}, {transform_indices = @transform_3, window_bounds = array<i64: 32, 384>}]} {
    %c0 = arith.constant 0 : index
    %c0_0 = arith.constant 0 : index
    %0 = vector.load %arg2[%c0, %c0_0] : memref<32x128xbf16, #tpu.memory_space<vmem>>, vector<32x128xbf16>
    %c0_1 = arith.constant 0 : index
    %c0_2 = arith.constant 0 : index
    %1 = vector.load %arg3[%c0_1, %c0_2] : memref<128x384xbf16, #tpu.memory_space<vmem>>, vector<128x384xbf16>
    %cst = arith.constant dense<0.000000e+00> : vector<32x384xf32>
    %2 = tpu.matmul %0, %1, %cst {dimension_numbers = #tpu.dot_dimension_numbers<[1], [0], [0], [1], [0, 0, 1, 1], [], []>} : vector<32x128xbf16>, vector<128x384xbf16>, vector<32x384xf32> -> vector<32x384xf32>
    %c0_3 = arith.constant 0 : index
    %c0_4 = arith.constant 0 : index
    %3 = vector.load %arg4[%c0_3, %c0_4] : memref<1x384xf32, #tpu.memory_space<vmem>>, vector<1x384xf32>
    %4 = vector.broadcast %3 : vector<1x384xf32> to vector<32x384xf32>
    %5 = arith.addf %2, %4 : vector<32x384xf32>
    %6 = arith.truncf %5 : vector<32x384xf32> to vector<32x384xbf16>
    %c0_5 = arith.constant 0 : index
    %c0_6 = arith.constant 0 : index
    %7 = vector.load %arg5[%c0_5, %c0_6] : memref<32x384xbf16, #tpu.memory_space<vmem>>, vector<32x384xbf16>
    tpu.vector_store %arg5[%c0_5, %c0_6], %6 {strides = array<i32>} : memref<32x384xbf16, #tpu.memory_space<vmem>>, vector<32x384xbf16>,
    return
  }
  func.func @transform_0(%arg0: i32, %arg1: i32) -> (i32, i32) {
    %c0_i32 = arith.constant 0 : i32
    %c0_i32_0 = arith.constant 0 : i32
    return %arg0, %c0_i32 : i32, i32
  }
  func.func @transform_1(%arg0: i32, %arg1: i32) -> (i32, i32) {
    %c0_i32 = arith.constant 0 : i32
    %c0_i32_0 = arith.constant 0 : i32
    return %c0_i32, %arg1 : i32, i32
  }
  func.func @transform_2(%arg0: i32, %arg1: i32) -> (i32, i32) {
    %c0_i32 = arith.constant 0 : i32
    %c0_i32_0 = arith.constant 0 : i32
    return %c0_i32, %arg1 : i32, i32
  }
  func.func @transform_3(%arg0: i32, %arg1: i32) -> (i32, i32) {
    %c0_i32 = arith.constant 0 : i32
    return %arg0, %arg1 : i32, i32
  }
}

module attributes {stable_mosaic.version = 11 : i64} {
  func.func @_attention_kernel(%arg0: i32, %arg1: i32, %arg2: memref<1x16x128xbf16, #tpu.memory_space<vmem>>, %arg3: memref<1x16x128xbf16, #tpu.memory_space<vmem>>, %arg4: memref<1x16x128xbf16, #tpu.memory_space<vmem>>, %arg5: memref<1x1x16xf32, #tpu.memory_space<vmem>>, %arg6: memref<1x16x128xbf16, #tpu.memory_space<vmem>>) attributes {dimension_semantics = [#tpu.dimension_semantics<parallel>, #tpu.dimension_semantics<parallel>], iteration_bounds = array<i64: 2, 1>, scalar_prefetch = 0 : i64, scratch_operands = 0 : i64, tpu.core_type = #tpu.core_type<tc>, window_params = [{transform_indices = @transform_0, window_bounds = array<i64: 1, 16, 128>}, {transform_indices = @transform_1, window_bounds = array<i64: 1, 16, 128>}, {transform_indices = @transform_2, window_bounds = array<i64: 1, 16, 128>}, {transform_indices = @transform_3, window_bounds = array<i64: 1, 1, 16>}, {transform_indices = @transform_4, window_bounds = array<i64: 1, 16, 128>}]} {
    %c0 = arith.constant 0 : index
    %c0_0 = arith.constant 0 : index
    %c0_1 = arith.constant 0 : index
    %0 = vector.load %arg2[%c0, %c0_0, %c0_1] : memref<1x16x128xbf16, #tpu.memory_space<vmem>>, vector<1x16x128xbf16>
    %1 = vector.shape_cast %0 : vector<1x16x128xbf16> to vector<16x128xbf16>
    %c0_2 = arith.constant 0 : index
    %c0_3 = arith.constant 0 : index
    %c0_4 = arith.constant 0 : index
    %2 = vector.load %arg3[%c0_2, %c0_3, %c0_4] : memref<1x16x128xbf16, #tpu.memory_space<vmem>>, vector<1x16x128xbf16>
    %3 = vector.shape_cast %2 : vector<1x16x128xbf16> to vector<16x128xbf16>
    %c0_5 = arith.constant 0 : index
    %c0_6 = arith.constant 0 : index
    %c0_7 = arith.constant 0 : index
    %4 = vector.load %arg4[%c0_5, %c0_6, %c0_7] : memref<1x16x128xbf16, #tpu.memory_space<vmem>>, vector<1x16x128xbf16>
    %5 = vector.shape_cast %4 : vector<1x16x128xbf16> to vector<16x128xbf16>
    %c0_8 = arith.constant 0 : index
    %c0_9 = arith.constant 0 : index
    %c0_10 = arith.constant 0 : index
    %6 = vector.load %arg5[%c0_8, %c0_9, %c0_10] : memref<1x1x16xf32, #tpu.memory_space<vmem>>, vector<1x1x16xf32>
    %7 = vector.shape_cast %6 : vector<1x1x16xf32> to vector<1x16xf32>
    %8 = vector.extract_strided_slice %1 {offsets = [0, 0], sizes = [16, 32], strides = [1, 1]} : vector<16x128xbf16> to vector<16x32xbf16>
    %9 = vector.extract_strided_slice %3 {offsets = [0, 0], sizes = [16, 32], strides = [1, 1]} : vector<16x128xbf16> to vector<16x32xbf16>
    %cst = arith.constant dense<0.000000e+00> : vector<16x16xf32>
    %10 = tpu.matmul %8, %9, %cst {dimension_numbers = #tpu.dot_dimension_numbers<[1], [1], [0], [0], [0, 0, 1, 0], [], []>} : vector<16x32xbf16>, vector<16x32xbf16>, vector<16x16xf32> -> vector<16x16xf32>
    %cst_11 = arith.constant 0.176776692 : f32
    %11 = vector.broadcast %cst_11 : f32 to vector<16x16xf32>
    %12 = arith.mulf %10, %11 : vector<16x16xf32>
    %13 = vector.broadcast %7 : vector<1x16xf32> to vector<16x16xf32>
    %14 = arith.addf %12, %13 : vector<16x16xf32>
    %cst_12 = arith.constant dense<0xFF800000> : vector<16xf32>
    %15 = vector.multi_reduction <maximumf>, %14, %cst_12 [1] : vector<16x16xf32> to vector<16xf32>
    %16 = vector.shape_cast %15 : vector<16xf32> to vector<16x1xf32>
    %17 = vector.broadcast %16 : vector<16x1xf32> to vector<16x16xf32>
    %18 = arith.subf %14, %17 : vector<16x16xf32>
    %19 = math.exp %18 : vector<16x16xf32>
    %cst_13 = arith.constant dense<0.000000e+00> : vector<16xf32>
    %20 = vector.multi_reduction <add>, %19, %cst_13 [1] : vector<16x16xf32> to vector<16xf32>
    %21 = vector.shape_cast %20 : vector<16xf32> to vector<16x1xf32>
    %22 = tpu.reciprocal %21 {approx = true} : vector<16x1xf32> -> vector<16x1xf32>
    %23 = vector.broadcast %22 : vector<16x1xf32> to vector<16x16xf32>
    %24 = arith.mulf %19, %23 : vector<16x16xf32>
    %25 = arith.truncf %24 : vector<16x16xf32> to vector<16x16xbf16>
    %26 = vector.extract_strided_slice %5 {offsets = [0, 0], sizes = [16, 32], strides = [1, 1]} : vector<16x128xbf16> to vector<16x32xbf16>
    %cst_14 = arith.constant dense<0.000000e+00> : vector<16x32xf32>
    %27 = tpu.matmul %25, %26, %cst_14 {dimension_numbers = #tpu.dot_dimension_numbers<[1], [0], [0], [1], [0, 0, 1, 1], [], []>} : vector<16x16xbf16>, vector<16x32xbf16>, vector<16x32xf32> -> vector<16x32xf32>
    %28 = vector.extract_strided_slice %1 {offsets = [0, 32], sizes = [16, 32], strides = [1, 1]} : vector<16x128xbf16> to vector<16x32xbf16>
    %29 = vector.extract_strided_slice %3 {offsets = [0, 32], sizes = [16, 32], strides = [1, 1]} : vector<16x128xbf16> to vector<16x32xbf16>
    %cst_15 = arith.constant dense<0.000000e+00> : vector<16x16xf32>
    %30 = tpu.matmul %28, %29, %cst_15 {dimension_numbers = #tpu.dot_dimension_numbers<[1], [1], [0], [0], [0, 0, 1, 0], [], []>} : vector<16x32xbf16>, vector<16x32xbf16>, vector<16x16xf32> -> vector<16x16xf32>
    %cst_16 = arith.constant 0.176776692 : f32
    %31 = vector.broadcast %cst_16 : f32 to vector<16x16xf32>
    %32 = arith.mulf %30, %31 : vector<16x16xf32>
    %33 = vector.broadcast %7 : vector<1x16xf32> to vector<16x16xf32>
    %34 = arith.addf %32, %33 : vector<16x16xf32>
    %cst_17 = arith.constant dense<0xFF800000> : vector<16xf32>
    %35 = vector.multi_reduction <maximumf>, %34, %cst_17 [1] : vector<16x16xf32> to vector<16xf32>
    %36 = vector.shape_cast %35 : vector<16xf32> to vector<16x1xf32>
    %37 = vector.broadcast %36 : vector<16x1xf32> to vector<16x16xf32>
    %38 = arith.subf %34, %37 : vector<16x16xf32>
    %39 = math.exp %38 : vector<16x16xf32>
    %cst_18 = arith.constant dense<0.000000e+00> : vector<16xf32>
    %40 = vector.multi_reduction <add>, %39, %cst_18 [1] : vector<16x16xf32> to vector<16xf32>
    %41 = vector.shape_cast %40 : vector<16xf32> to vector<16x1xf32>
    %42 = tpu.reciprocal %41 {approx = true} : vector<16x1xf32> -> vector<16x1xf32>
    %43 = vector.broadcast %42 : vector<16x1xf32> to vector<16x16xf32>
    %44 = arith.mulf %39, %43 : vector<16x16xf32>
    %45 = arith.truncf %44 : vector<16x16xf32> to vector<16x16xbf16>
    %46 = vector.extract_strided_slice %5 {offsets = [0, 32], sizes = [16, 32], strides = [1, 1]} : vector<16x128xbf16> to vector<16x32xbf16>
    %cst_19 = arith.constant dense<0.000000e+00> : vector<16x32xf32>
    %47 = tpu.matmul %45, %46, %cst_19 {dimension_numbers = #tpu.dot_dimension_numbers<[1], [0], [0], [1], [0, 0, 1, 1], [], []>} : vector<16x16xbf16>, vector<16x32xbf16>, vector<16x32xf32> -> vector<16x32xf32>
    %48 = vector.extract_strided_slice %1 {offsets = [0, 64], sizes = [16, 32], strides = [1, 1]} : vector<16x128xbf16> to vector<16x32xbf16>
    %49 = vector.extract_strided_slice %3 {offsets = [0, 64], sizes = [16, 32], strides = [1, 1]} : vector<16x128xbf16> to vector<16x32xbf16>
    %cst_20 = arith.constant dense<0.000000e+00> : vector<16x16xf32>
    %50 = tpu.matmul %48, %49, %cst_20 {dimension_numbers = #tpu.dot_dimension_numbers<[1], [1], [0], [0], [0, 0, 1, 0], [], []>} : vector<16x32xbf16>, vector<16x32xbf16>, vector<16x16xf32> -> vector<16x16xf32>
    %cst_21 = arith.constant 0.176776692 : f32
    %51 = vector.broadcast %cst_21 : f32 to vector<16x16xf32>
    %52 = arith.mulf %50, %51 : vector<16x16xf32>
    %53 = vector.broadcast %7 : vector<1x16xf32> to vector<16x16xf32>
    %54 = arith.addf %52, %53 : vector<16x16xf32>
    %cst_22 = arith.constant dense<0xFF800000> : vector<16xf32>
    %55 = vector.multi_reduction <maximumf>, %54, %cst_22 [1] : vector<16x16xf32> to vector<16xf32>
    %56 = vector.shape_cast %55 : vector<16xf32> to vector<16x1xf32>
    %57 = vector.broadcast %56 : vector<16x1xf32> to vector<16x16xf32>
    %58 = arith.subf %54, %57 : vector<16x16xf32>
    %59 = math.exp %58 : vector<16x16xf32>
    %cst_23 = arith.constant dense<0.000000e+00> : vector<16xf32>
    %60 = vector.multi_reduction <add>, %59, %cst_23 [1] : vector<16x16xf32> to vector<16xf32>
    %61 = vector.shape_cast %60 : vector<16xf32> to vector<16x1xf32>
    %62 = tpu.reciprocal %61 {approx = true} : vector<16x1xf32> -> vector<16x1xf32>
    %63 = vector.broadcast %62 : vector<16x1xf32> to vector<16x16xf32>
    %64 = arith.mulf %59, %63 : vector<16x16xf32>
    %65 = arith.truncf %64 : vector<16x16xf32> to vector<16x16xbf16>
    %66 = vector.extract_strided_slice %5 {offsets = [0, 64], sizes = [16, 32], strides = [1, 1]} : vector<16x128xbf16> to vector<16x32xbf16>
    %cst_24 = arith.constant dense<0.000000e+00> : vector<16x32xf32>
    %67 = tpu.matmul %65, %66, %cst_24 {dimension_numbers = #tpu.dot_dimension_numbers<[1], [0], [0], [1], [0, 0, 1, 1], [], []>} : vector<16x16xbf16>, vector<16x32xbf16>, vector<16x32xf32> -> vector<16x32xf32>
    %68 = vector.extract_strided_slice %1 {offsets = [0, 96], sizes = [16, 32], strides = [1, 1]} : vector<16x128xbf16> to vector<16x32xbf16>
    %69 = vector.extract_strided_slice %3 {offsets = [0, 96], sizes = [16, 32], strides = [1, 1]} : vector<16x128xbf16> to vector<16x32xbf16>
    %cst_25 = arith.constant dense<0.000000e+00> : vector<16x16xf32>
    %70 = tpu.matmul %68, %69, %cst_25 {dimension_numbers = #tpu.dot_dimension_numbers<[1], [1], [0], [0], [0, 0, 1, 0], [], []>} : vector<16x32xbf16>, vector<16x32xbf16>, vector<16x16xf32> -> vector<16x16xf32>
    %cst_26 = arith.constant 0.176776692 : f32
    %71 = vector.broadcast %cst_26 : f32 to vector<16x16xf32>
    %72 = arith.mulf %70, %71 : vector<16x16xf32>
    %73 = vector.broadcast %7 : vector<1x16xf32> to vector<16x16xf32>
    %74 = arith.addf %72, %73 : vector<16x16xf32>
    %cst_27 = arith.constant dense<0xFF800000> : vector<16xf32>
    %75 = vector.multi_reduction <maximumf>, %74, %cst_27 [1] : vector<16x16xf32> to vector<16xf32>
    %76 = vector.shape_cast %75 : vector<16xf32> to vector<16x1xf32>
    %77 = vector.broadcast %76 : vector<16x1xf32> to vector<16x16xf32>
    %78 = arith.subf %74, %77 : vector<16x16xf32>
    %79 = math.exp %78 : vector<16x16xf32>
    %cst_28 = arith.constant dense<0.000000e+00> : vector<16xf32>
    %80 = vector.multi_reduction <add>, %79, %cst_28 [1] : vector<16x16xf32> to vector<16xf32>
    %81 = vector.shape_cast %80 : vector<16xf32> to vector<16x1xf32>
    %82 = tpu.reciprocal %81 {approx = true} : vector<16x1xf32> -> vector<16x1xf32>
    %83 = vector.broadcast %82 : vector<16x1xf32> to vector<16x16xf32>
    %84 = arith.mulf %79, %83 : vector<16x16xf32>
    %85 = arith.truncf %84 : vector<16x16xf32> to vector<16x16xbf16>
    %86 = vector.extract_strided_slice %5 {offsets = [0, 96], sizes = [16, 32], strides = [1, 1]} : vector<16x128xbf16> to vector<16x32xbf16>
    %cst_29 = arith.constant dense<0.000000e+00> : vector<16x32xf32>
    %87 = tpu.matmul %85, %86, %cst_29 {dimension_numbers = #tpu.dot_dimension_numbers<[1], [0], [0], [1], [0, 0, 1, 1], [], []>} : vector<16x16xbf16>, vector<16x32xbf16>, vector<16x32xf32> -> vector<16x32xf32>
    %88 = tpu.concatenate %27, %47, %67, %87 in 1 : vector<16x32xf32>, vector<16x32xf32>, vector<16x32xf32>, vector<16x32xf32> -> vector<16x128xf32>
    %89 = arith.truncf %88 : vector<16x128xf32> to vector<16x128xbf16>
    %c0_30 = arith.constant 0 : index
    %c0_31 = arith.constant 0 : index
    %c0_32 = arith.constant 0 : index
    %90 = vector.load %arg6[%c0_30, %c0_31, %c0_32] : memref<1x16x128xbf16, #tpu.memory_space<vmem>>, vector<1x16x128xbf16>
    %91 = vector.shape_cast %90 : vector<1x16x128xbf16> to vector<16x128xbf16>
    %92 = vector.shape_cast %89 : vector<16x128xbf16> to vector<1x16x128xbf16>
    tpu.vector_store %arg6[%c0_30, %c0_31, %c0_32], %92 {strides = array<i32>} : memref<1x16x128xbf16, #tpu.memory_space<vmem>>, vector<1x16x128xbf16>,
    return
  }
  func.func @transform_0(%arg0: i32, %arg1: i32) -> (i32, i32, i32) {
    %c0_i32 = arith.constant 0 : i32
    %c0_i32_0 = arith.constant 0 : i32
    return %arg0, %c0_i32, %arg1 : i32, i32, i32
  }
  func.func @transform_1(%arg0: i32, %arg1: i32) -> (i32, i32, i32) {
    %c1_i32 = arith.constant 1 : i32
    %0 = arith.addi %c1_i32, %arg1 : i32
    %c0_i32 = arith.constant 0 : i32
    %c0_i32_0 = arith.constant 0 : i32
    return %arg0, %c0_i32, %0 : i32, i32, i32
  }
  func.func @transform_2(%arg0: i32, %arg1: i32) -> (i32, i32, i32) {
    %c2_i32 = arith.constant 2 : i32
    %0 = arith.addi %c2_i32, %arg1 : i32
    %c0_i32 = arith.constant 0 : i32
    %c0_i32_0 = arith.constant 0 : i32
    return %arg0, %c0_i32, %0 : i32, i32, i32
  }
  func.func @transform_3(%arg0: i32, %arg1: i32) -> (i32, i32, i32) {
    %c0_i32 = arith.constant 0 : i32
    %c0_i32_0 = arith.constant 0 : i32
    %c0_i32_1 = arith.constant 0 : i32
    return %arg0, %c0_i32, %c0_i32_0 : i32, i32, i32
  }
  func.func @transform_4(%arg0: i32, %arg1: i32) -> (i32, i32, i32) {
    %c0_i32 = arith.constant 0 : i32
    %c0_i32_0 = arith.constant 0 : i32
    return %arg0, %c0_i32, %arg1 : i32, i32, i32
  }
}

module attributes {stable_mosaic.version = 11 : i64} {
  func.func @_linear_res_ln_fullk_kernel(%arg0: i32, %arg1: memref<32x128xbf16, #tpu.memory_space<vmem>>, %arg2: memref<128x128xbf16, #tpu.memory_space<vmem>>, %arg3: memref<1x128xf32, #tpu.memory_space<vmem>>, %arg4: memref<32x128xbf16, #tpu.memory_space<vmem>>, %arg5: memref<1x128xf32, #tpu.memory_space<vmem>>, %arg6: memref<1x128xf32, #tpu.memory_space<vmem>>, %arg7: memref<32x128xbf16, #tpu.memory_space<vmem>>) attributes {dimension_semantics = [#tpu.dimension_semantics<parallel>], iteration_bounds = array<i64: 1>, scalar_prefetch = 0 : i64, scratch_operands = 0 : i64, tpu.core_type = #tpu.core_type<tc>, window_params = [{transform_indices = @transform_0, window_bounds = array<i64: 32, 128>}, {pipeline_mode = #tpu.pipeline_mode<synchronous>, transform_indices = @transform_1, window_bounds = array<i64: 128, 128>}, {pipeline_mode = #tpu.pipeline_mode<synchronous>, transform_indices = @transform_2, window_bounds = array<i64: 1, 128>}, {transform_indices = @transform_3, window_bounds = array<i64: 32, 128>}, {pipeline_mode = #tpu.pipeline_mode<synchronous>, transform_indices = @transform_4, window_bounds = array<i64: 1, 128>}, {pipeline_mode = #tpu.pipeline_mode<synchronous>, transform_indices = @transform_5, window_bounds = array<i64: 1, 128>}, {transform_indices = @transform_6, window_bounds = array<i64: 32, 128>}]} {
    %c0 = arith.constant 0 : index
    %c0_0 = arith.constant 0 : index
    %0 = vector.load %arg1[%c0, %c0_0] : memref<32x128xbf16, #tpu.memory_space<vmem>>, vector<32x128xbf16>
    %c0_1 = arith.constant 0 : index
    %c0_2 = arith.constant 0 : index
    %1 = vector.load %arg2[%c0_1, %c0_2] : memref<128x128xbf16, #tpu.memory_space<vmem>>, vector<128x128xbf16>
    %cst = arith.constant dense<0.000000e+00> : vector<32x128xf32>
    %2 = tpu.matmul %0, %1, %cst {dimension_numbers = #tpu.dot_dimension_numbers<[1], [0], [0], [1], [0, 0, 1, 1], [], []>} : vector<32x128xbf16>, vector<128x128xbf16>, vector<32x128xf32> -> vector<32x128xf32>
    %c0_3 = arith.constant 0 : index
    %c0_4 = arith.constant 0 : index
    %3 = vector.load %arg3[%c0_3, %c0_4] : memref<1x128xf32, #tpu.memory_space<vmem>>, vector<1x128xf32>
    %4 = vector.broadcast %3 : vector<1x128xf32> to vector<32x128xf32>
    %5 = arith.addf %2, %4 : vector<32x128xf32>
    %c0_5 = arith.constant 0 : index
    %c0_6 = arith.constant 0 : index
    %6 = vector.load %arg4[%c0_5, %c0_6] : memref<32x128xbf16, #tpu.memory_space<vmem>>, vector<32x128xbf16>
    %7 = arith.extf %6 : vector<32x128xbf16> to vector<32x128xf32>
    %8 = arith.addf %5, %7 : vector<32x128xf32>
    %cst_7 = arith.constant dense<0.000000e+00> : vector<32xf32>
    %9 = vector.multi_reduction <add>, %8, %cst_7 [1] : vector<32x128xf32> to vector<32xf32>
    %10 = vector.shape_cast %9 : vector<32xf32> to vector<32x1xf32>
    %cst_8 = arith.constant 1.280000e+02 : f32
    %11 = vector.broadcast %cst_8 : f32 to vector<32x1xf32>
    %12 = arith.divf %10, %11 : vector<32x1xf32>
    %13 = vector.broadcast %12 : vector<32x1xf32> to vector<32x128xf32>
    %14 = arith.subf %8, %13 : vector<32x128xf32>
    %15 = arith.mulf %14, %14 : vector<32x128xf32>
    %cst_9 = arith.constant dense<0.000000e+00> : vector<32xf32>
    %16 = vector.multi_reduction <add>, %15, %cst_9 [1] : vector<32x128xf32> to vector<32xf32>
    %17 = vector.shape_cast %16 : vector<32xf32> to vector<32x1xf32>
    %cst_10 = arith.constant 1.280000e+02 : f32
    %18 = vector.broadcast %cst_10 : f32 to vector<32x1xf32>
    %19 = arith.divf %17, %18 : vector<32x1xf32>
    %20 = vector.broadcast %12 : vector<32x1xf32> to vector<32x128xf32>
    %21 = arith.subf %8, %20 : vector<32x128xf32>
    %cst_11 = arith.constant 9.99999974E-6 : f32
    %22 = vector.broadcast %cst_11 : f32 to vector<32x1xf32>
    %23 = arith.addf %19, %22 : vector<32x1xf32>
    %24 = math.rsqrt %23 : vector<32x1xf32>
    %25 = vector.broadcast %24 : vector<32x1xf32> to vector<32x128xf32>
    %26 = arith.mulf %21, %25 : vector<32x128xf32>
    %c0_12 = arith.constant 0 : index
    %c0_13 = arith.constant 0 : index
    %27 = vector.load %arg5[%c0_12, %c0_13] : memref<1x128xf32, #tpu.memory_space<vmem>>, vector<1x128xf32>
    %28 = vector.broadcast %27 : vector<1x128xf32> to vector<32x128xf32>
    %29 = arith.mulf %26, %28 : vector<32x128xf32>
    %c0_14 = arith.constant 0 : index
    %c0_15 = arith.constant 0 : index
    %30 = vector.load %arg6[%c0_14, %c0_15] : memref<1x128xf32, #tpu.memory_space<vmem>>, vector<1x128xf32>
    %31 = vector.broadcast %30 : vector<1x128xf32> to vector<32x128xf32>
    %32 = arith.addf %29, %31 : vector<32x128xf32>
    %33 = arith.truncf %32 : vector<32x128xf32> to vector<32x128xbf16>
    %c0_16 = arith.constant 0 : index
    %c0_17 = arith.constant 0 : index
    %34 = vector.load %arg7[%c0_16, %c0_17] : memref<32x128xbf16, #tpu.memory_space<vmem>>, vector<32x128xbf16>
    tpu.vector_store %arg7[%c0_16, %c0_17], %33 {strides = array<i32>} : memref<32x128xbf16, #tpu.memory_space<vmem>>, vector<32x128xbf16>,
    return
  }
  func.func @transform_0(%arg0: i32) -> (i32, i32) {
    %c0_i32 = arith.constant 0 : i32
    %c0_i32_0 = arith.constant 0 : i32
    return %arg0, %c0_i32 : i32, i32
  }
  func.func @transform_1(%arg0: i32) -> (i32, i32) {
    %c0_i32 = arith.constant 0 : i32
    %c0_i32_0 = arith.constant 0 : i32
    %c0_i32_1 = arith.constant 0 : i32
    return %c0_i32, %c0_i32_0 : i32, i32
  }
  func.func @transform_2(%arg0: i32) -> (i32, i32) {
    %c0_i32 = arith.constant 0 : i32
    %c0_i32_0 = arith.constant 0 : i32
    %c0_i32_1 = arith.constant 0 : i32
    return %c0_i32, %c0_i32_0 : i32, i32
  }
  func.func @transform_3(%arg0: i32) -> (i32, i32) {
    %c0_i32 = arith.constant 0 : i32
    %c0_i32_0 = arith.constant 0 : i32
    return %arg0, %c0_i32 : i32, i32
  }
  func.func @transform_4(%arg0: i32) -> (i32, i32) {
    %c0_i32 = arith.constant 0 : i32
    %c0_i32_0 = arith.constant 0 : i32
    %c0_i32_1 = arith.constant 0 : i32
    return %c0_i32, %c0_i32_0 : i32, i32
  }
  func.func @transform_5(%arg0: i32) -> (i32, i32) {
    %c0_i32 = arith.constant 0 : i32
    %c0_i32_0 = arith.constant 0 : i32
    %c0_i32_1 = arith.constant 0 : i32
    return %c0_i32, %c0_i32_0 : i32, i32
  }
  func.func @transform_6(%arg0: i32) -> (i32, i32) {
    %c0_i32 = arith.constant 0 : i32
    %c0_i32_0 = arith.constant 0 : i32
    return %arg0, %c0_i32 : i32, i32
  }
}

module attributes {stable_mosaic.version = 11 : i64} {
  func.func @_linear_fullk_kernel(%arg0: i32, %arg1: i32, %arg2: memref<32x128xbf16, #tpu.memory_space<vmem>>, %arg3: memref<128x256xbf16, #tpu.memory_space<vmem>>, %arg4: memref<1x256xf32, #tpu.memory_space<vmem>>, %arg5: memref<32x256xbf16, #tpu.memory_space<vmem>>) attributes {dimension_semantics = [#tpu.dimension_semantics<parallel>, #tpu.dimension_semantics<parallel>], iteration_bounds = array<i64: 1, 1>, scalar_prefetch = 0 : i64, scratch_operands = 0 : i64, tpu.core_type = #tpu.core_type<tc>, window_params = [{transform_indices = @transform_0, window_bounds = array<i64: 32, 128>}, {transform_indices = @transform_1, window_bounds = array<i64: 128, 256>}, {transform_indices = @transform_2, window_bounds = array<i64: 1, 256>}, {transform_indices = @transform_3, window_bounds = array<i64: 32, 256>}]} {
    %c0 = arith.constant 0 : index
    %c0_0 = arith.constant 0 : index
    %0 = vector.load %arg2[%c0, %c0_0] : memref<32x128xbf16, #tpu.memory_space<vmem>>, vector<32x128xbf16>
    %c0_1 = arith.constant 0 : index
    %c0_2 = arith.constant 0 : index
    %1 = vector.load %arg3[%c0_1, %c0_2] : memref<128x256xbf16, #tpu.memory_space<vmem>>, vector<128x256xbf16>
    %cst = arith.constant dense<0.000000e+00> : vector<32x256xf32>
    %2 = tpu.matmul %0, %1, %cst {dimension_numbers = #tpu.dot_dimension_numbers<[1], [0], [0], [1], [0, 0, 1, 1], [], []>} : vector<32x128xbf16>, vector<128x256xbf16>, vector<32x256xf32> -> vector<32x256xf32>
    %c0_3 = arith.constant 0 : index
    %c0_4 = arith.constant 0 : index
    %3 = vector.load %arg4[%c0_3, %c0_4] : memref<1x256xf32, #tpu.memory_space<vmem>>, vector<1x256xf32>
    %4 = vector.broadcast %3 : vector<1x256xf32> to vector<32x256xf32>
    %5 = arith.addf %2, %4 : vector<32x256xf32>
    %cst_5 = arith.constant 5.000000e-01 : f32
    %6 = vector.broadcast %cst_5 : f32 to vector<32x256xf32>
    %7 = arith.mulf %6, %5 : vector<32x256xf32>
    %cst_6 = arith.constant 4.471500e-02 : f32
    %8 = vector.broadcast %cst_6 : f32 to vector<32x256xf32>
    %9 = arith.mulf %8, %5 : vector<32x256xf32>
    %10 = arith.mulf %9, %5 : vector<32x256xf32>
    %11 = arith.mulf %10, %5 : vector<32x256xf32>
    %12 = arith.addf %5, %11 : vector<32x256xf32>
    %cst_7 = arith.constant 0.797884583 : f32
    %13 = vector.broadcast %cst_7 : f32 to vector<32x256xf32>
    %14 = arith.mulf %13, %12 : vector<32x256xf32>
    %15 = math.tanh %14 : vector<32x256xf32>
    %cst_8 = arith.constant 1.000000e+00 : f32
    %16 = vector.broadcast %cst_8 : f32 to vector<32x256xf32>
    %17 = arith.addf %16, %15 : vector<32x256xf32>
    %18 = arith.mulf %7, %17 : vector<32x256xf32>
    %19 = arith.truncf %18 : vector<32x256xf32> to vector<32x256xbf16>
    %c0_9 = arith.constant 0 : index
    %c0_10 = arith.constant 0 : index
    %20 = vector.load %arg5[%c0_9, %c0_10] : memref<32x256xbf16, #tpu.memory_space<vmem>>, vector<32x256xbf16>
    tpu.vector_store %arg5[%c0_9, %c0_10], %19 {strides = array<i32>} : memref<32x256xbf16, #tpu.memory_space<vmem>>, vector<32x256xbf16>,
    return
  }
  func.func @transform_0(%arg0: i32, %arg1: i32) -> (i32, i32) {
    %c0_i32 = arith.constant 0 : i32
    %c0_i32_0 = arith.constant 0 : i32
    return %arg0, %c0_i32 : i32, i32
  }
  func.func @transform_1(%arg0: i32, %arg1: i32) -> (i32, i32) {
    %c0_i32 = arith.constant 0 : i32
    %c0_i32_0 = arith.constant 0 : i32
    return %c0_i32, %arg1 : i32, i32
  }
  func.func @transform_2(%arg0: i32, %arg1: i32) -> (i32, i32) {
    %c0_i32 = arith.constant 0 : i32
    %c0_i32_0 = arith.constant 0 : i32
    return %c0_i32, %arg1 : i32, i32
  }
  func.func @transform_3(%arg0: i32, %arg1: i32) -> (i32, i32) {
    %c0_i32 = arith.constant 0 : i32
    return %arg0, %arg1 : i32, i32
  }
}

module attributes {stable_mosaic.version = 11 : i64} {
  func.func @_linear_res_ln_fullk_kernel(%arg0: i32, %arg1: memref<32x256xbf16, #tpu.memory_space<vmem>>, %arg2: memref<256x128xbf16, #tpu.memory_space<vmem>>, %arg3: memref<1x128xf32, #tpu.memory_space<vmem>>, %arg4: memref<32x128xbf16, #tpu.memory_space<vmem>>, %arg5: memref<1x128xf32, #tpu.memory_space<vmem>>, %arg6: memref<1x128xf32, #tpu.memory_space<vmem>>, %arg7: memref<32x128xbf16, #tpu.memory_space<vmem>>) attributes {dimension_semantics = [#tpu.dimension_semantics<parallel>], iteration_bounds = array<i64: 1>, scalar_prefetch = 0 : i64, scratch_operands = 0 : i64, tpu.core_type = #tpu.core_type<tc>, window_params = [{transform_indices = @transform_0, window_bounds = array<i64: 32, 256>}, {pipeline_mode = #tpu.pipeline_mode<synchronous>, transform_indices = @transform_1, window_bounds = array<i64: 256, 128>}, {pipeline_mode = #tpu.pipeline_mode<synchronous>, transform_indices = @transform_2, window_bounds = array<i64: 1, 128>}, {transform_indices = @transform_3, window_bounds = array<i64: 32, 128>}, {pipeline_mode = #tpu.pipeline_mode<synchronous>, transform_indices = @transform_4, window_bounds = array<i64: 1, 128>}, {pipeline_mode = #tpu.pipeline_mode<synchronous>, transform_indices = @transform_5, window_bounds = array<i64: 1, 128>}, {transform_indices = @transform_6, window_bounds = array<i64: 32, 128>}]} {
    %c0 = arith.constant 0 : index
    %c0_0 = arith.constant 0 : index
    %0 = vector.load %arg1[%c0, %c0_0] : memref<32x256xbf16, #tpu.memory_space<vmem>>, vector<32x256xbf16>
    %c0_1 = arith.constant 0 : index
    %c0_2 = arith.constant 0 : index
    %1 = vector.load %arg2[%c0_1, %c0_2] : memref<256x128xbf16, #tpu.memory_space<vmem>>, vector<256x128xbf16>
    %cst = arith.constant dense<0.000000e+00> : vector<32x128xf32>
    %2 = tpu.matmul %0, %1, %cst {dimension_numbers = #tpu.dot_dimension_numbers<[1], [0], [0], [1], [0, 0, 1, 1], [], []>} : vector<32x256xbf16>, vector<256x128xbf16>, vector<32x128xf32> -> vector<32x128xf32>
    %c0_3 = arith.constant 0 : index
    %c0_4 = arith.constant 0 : index
    %3 = vector.load %arg3[%c0_3, %c0_4] : memref<1x128xf32, #tpu.memory_space<vmem>>, vector<1x128xf32>
    %4 = vector.broadcast %3 : vector<1x128xf32> to vector<32x128xf32>
    %5 = arith.addf %2, %4 : vector<32x128xf32>
    %c0_5 = arith.constant 0 : index
    %c0_6 = arith.constant 0 : index
    %6 = vector.load %arg4[%c0_5, %c0_6] : memref<32x128xbf16, #tpu.memory_space<vmem>>, vector<32x128xbf16>
    %7 = arith.extf %6 : vector<32x128xbf16> to vector<32x128xf32>
    %8 = arith.addf %5, %7 : vector<32x128xf32>
    %cst_7 = arith.constant dense<0.000000e+00> : vector<32xf32>
    %9 = vector.multi_reduction <add>, %8, %cst_7 [1] : vector<32x128xf32> to vector<32xf32>
    %10 = vector.shape_cast %9 : vector<32xf32> to vector<32x1xf32>
    %cst_8 = arith.constant 1.280000e+02 : f32
    %11 = vector.broadcast %cst_8 : f32 to vector<32x1xf32>
    %12 = arith.divf %10, %11 : vector<32x1xf32>
    %13 = vector.broadcast %12 : vector<32x1xf32> to vector<32x128xf32>
    %14 = arith.subf %8, %13 : vector<32x128xf32>
    %15 = arith.mulf %14, %14 : vector<32x128xf32>
    %cst_9 = arith.constant dense<0.000000e+00> : vector<32xf32>
    %16 = vector.multi_reduction <add>, %15, %cst_9 [1] : vector<32x128xf32> to vector<32xf32>
    %17 = vector.shape_cast %16 : vector<32xf32> to vector<32x1xf32>
    %cst_10 = arith.constant 1.280000e+02 : f32
    %18 = vector.broadcast %cst_10 : f32 to vector<32x1xf32>
    %19 = arith.divf %17, %18 : vector<32x1xf32>
    %20 = vector.broadcast %12 : vector<32x1xf32> to vector<32x128xf32>
    %21 = arith.subf %8, %20 : vector<32x128xf32>
    %cst_11 = arith.constant 9.99999974E-6 : f32
    %22 = vector.broadcast %cst_11 : f32 to vector<32x1xf32>
    %23 = arith.addf %19, %22 : vector<32x1xf32>
    %24 = math.rsqrt %23 : vector<32x1xf32>
    %25 = vector.broadcast %24 : vector<32x1xf32> to vector<32x128xf32>
    %26 = arith.mulf %21, %25 : vector<32x128xf32>
    %c0_12 = arith.constant 0 : index
    %c0_13 = arith.constant 0 : index
    %27 = vector.load %arg5[%c0_12, %c0_13] : memref<1x128xf32, #tpu.memory_space<vmem>>, vector<1x128xf32>
    %28 = vector.broadcast %27 : vector<1x128xf32> to vector<32x128xf32>
    %29 = arith.mulf %26, %28 : vector<32x128xf32>
    %c0_14 = arith.constant 0 : index
    %c0_15 = arith.constant 0 : index
    %30 = vector.load %arg6[%c0_14, %c0_15] : memref<1x128xf32, #tpu.memory_space<vmem>>, vector<1x128xf32>
    %31 = vector.broadcast %30 : vector<1x128xf32> to vector<32x128xf32>
    %32 = arith.addf %29, %31 : vector<32x128xf32>
    %33 = arith.truncf %32 : vector<32x128xf32> to vector<32x128xbf16>
    %c0_16 = arith.constant 0 : index
    %c0_17 = arith.constant 0 : index
    %34 = vector.load %arg7[%c0_16, %c0_17] : memref<32x128xbf16, #tpu.memory_space<vmem>>, vector<32x128xbf16>
    tpu.vector_store %arg7[%c0_16, %c0_17], %33 {strides = array<i32>} : memref<32x128xbf16, #tpu.memory_space<vmem>>, vector<32x128xbf16>,
    return
  }
  func.func @transform_0(%arg0: i32) -> (i32, i32) {
    %c0_i32 = arith.constant 0 : i32
    %c0_i32_0 = arith.constant 0 : i32
    return %arg0, %c0_i32 : i32, i32
  }
  func.func @transform_1(%arg0: i32) -> (i32, i32) {
    %c0_i32 = arith.constant 0 : i32
    %c0_i32_0 = arith.constant 0 : i32
    %c0_i32_1 = arith.constant 0 : i32
    return %c0_i32, %c0_i32_0 : i32, i32
  }
  func.func @transform_2(%arg0: i32) -> (i32, i32) {
    %c0_i32 = arith.constant 0 : i32
    %c0_i32_0 = arith.constant 0 : i32
    %c0_i32_1 = arith.constant 0 : i32
    return %c0_i32, %c0_i32_0 : i32, i32
  }
  func.func @transform_3(%arg0: i32) -> (i32, i32) {
    %c0_i32 = arith.constant 0 : i32
    %c0_i32_0 = arith.constant 0 : i32
    return %arg0, %c0_i32 : i32, i32
  }
  func.func @transform_4(%arg0: i32) -> (i32, i32) {
    %c0_i32 = arith.constant 0 : i32
    %c0_i32_0 = arith.constant 0 : i32
    %c0_i32_1 = arith.constant 0 : i32
    return %c0_i32, %c0_i32_0 : i32, i32
  }
  func.func @transform_5(%arg0: i32) -> (i32, i32) {
    %c0_i32 = arith.constant 0 : i32
    %c0_i32_0 = arith.constant 0 : i32
    %c0_i32_1 = arith.constant 0 : i32
    return %c0_i32, %c0_i32_0 : i32, i32
  }
  func.func @transform_6(%arg0: i32) -> (i32, i32) {
    %c0_i32 = arith.constant 0 : i32
    %c0_i32_0 = arith.constant 0 : i32
    return %arg0, %c0_i32 : i32, i32
  }
}

</mosaic_0001>

<bundles_post_ra>
// kernel: roberta_cor_forward.33
= control target key start
LH: loop header
LB: loop body
LE: loop exit
PB: predicated region body
PF: predicated region fallthrough
CT: control target
= control target key end

     0   :  { %s572_s18 = smov 0   ;;  %s574_s19 = smov 0   ;;  %s624_s0 = inlined_call_operand.vmem [shape: bf16[2,16,128], index: 0, kind: input, shape index: {}]   ;;  %s625_s1 = inlined_call_operand.vmem [shape: bf16[16,128], index: 1, kind: input, shape index: {}]   ;;  %s626_s2 = inlined_call_operand.vmem [shape: bf16[1,128], index: 2, kind: input, shape index: {}]   ;;  %s627_s3 = inlined_call_operand.vmem [shape: f32[1,128], index: 3, kind: input, shape index: {}]   ;;  %s628_s4 = inlined_call_operand.vmem [shape: f32[1,128], index: 4, kind: input, shape index: {}]   ;;  %s629_s5 = inlined_call_operand.vmem [shape: bf16[2,16,128], index: 5, kind: output, shape index: {}]  }
   0x1   :  { %s576_s20 = smov 0  }
   0x2 LB: > { %s27_s21 = sadd.s32 1, %s536_s19  ;;  %p462_p0 = scmp.ge.s32.totalorder %s540_s20, 1  ;;  %s540_s20 = sphi %s576_s20, %s15_s20   ;;  %s536_s19 = sphi %s574_s19, %s631_s19   ;;  %s532_s18 = sphi %s572_s18, %s630_s18  }
   0x3   : > { %p29_p1 = scmp.ge.s32.totalorder %s27_s21, 2  ;;  %p219_p2 = scmp.lt.s32.totalorder %s540_s20, 3 }
   0x5   : > { %s633_s21 = smov (%p29_p1, %s27_s21), 0  ;;  %p220_p3 = pnand %p462_p0, %p219_p2 }
   0x6   : > { %p261_p4 = scmp.lt.s32.totalorder (!%p220_p3), %s532_s18, 1 }
   0x7   : > { %223 = sbr.rel (%p220_p3) target bundleno = 335 (0x14f), region = 40 }
   0xc   : > { %v296_v0 = vld [vmem:[%s626_s2] sm:$0x1]  ;;  %v298_v1 = vlaneseq  ;;  %s635_s18 = smov (!%p261_p4, %s532_s18), 1 }
   0xd   : > { %v482_v2 = vld [vmem:[%s625_s1] sm:$0xff]   ;;  %v297_v4 = vunpack.c.l.bf16 %v296_v0  ;;  %s473_s26 = sshll.u32 %s635_s18, 3 }
   0xe   : > { %v299_v3 = vshrl.u32 %v298_v1, 7  ;;  %s268_s29 = scalar_lea.vmem %s624_s0, %s473_s26  ;;  %v483_v6 = vunpack.c.l.bf16 %v482_v2  ;;  %v484_v7 = vunpack.c.h.bf16 %v482_v2  ;;  %v467_v32 = vld [vmem:[%s627_s3] ss:$0 sm:$0xff]  ;;  %s284_s11 = scalar_lea.vmem %s629_s5, %s473_s26 }
   0xf   : > { %v478_v8 = vld [vmem:[%s268_s29] sm:$0xff]  }
  0x10   : > { %v300_v5 = vsub.s32 0, %v299_v3  ;;  %v479_v9 = vunpack.c.l.bf16 %v478_v8  ;;  %v480_v11 = vunpack.c.h.bf16 %v478_v8  ;;  %v468_v36 = vld [vmem:[%s628_s4] ss:$0 sm:$0xff] }
  0x12   : > { %v301_v10 = vrot.slane %v297_v4, %v300_v5  ;;  %v294_v12 = vadd.f32 %v483_v6, %v479_v9  ;;  %v295_v13 = vadd.f32 %v484_v7, %v480_v11 }
  0x14   : > { %v302_v14 = vadd.f32 %v301_v10, %v294_v12  ;;  %v303_v15 = vadd.f32 %v301_v10, %v295_v13 }
  0x16   : > { %304 = vadd.xlane.f32.xlu0 %v302_v14 }
  0x1a   : > { %306 = vadd.xlane.f32.xlu0 %v303_v15 }
  0x9f   : > { %v305_v16 = vpop.xlane.xlu0 %304 }
  0xa0   : > { %v309_v17 = vmul.f32 0.0078125, %v305_v16 }
  0xa2   : > { %v311_v18 = vsub.f32 %v302_v14, %v309_v17 }
  0xa3   : > { %v307_v19 = vpop.xlane.xlu0 %306 }
  0xa4   : > { %v310_v20 = vmul.f32 0.0078125, %v307_v19  ;;  %v313_v21 = vmul.f32 %v311_v18, %v311_v18 }
  0xa6   : > { %v312_v22 = vsub.f32 %v303_v15, %v310_v20  ;;  %315 = vadd.xlane.f32.xlu1 %v313_v21 }
  0xa8   : > { %v314_v23 = vmul.f32 %v312_v22, %v312_v22 }
  0xaa   : > { %317 = vadd.xlane.f32.xlu1 %v314_v23 }
 0x12f   : > { %v316_v24 = vpop.xlane.xlu1 %315 }
 0x130   : > { %v319_v25 = vmul.f32 0.0078125, %v316_v24 }
 0x132   : > { %v321_v26 = vadd.f32 1e-05, %v319_v25 }
 0x133   : > { %v318_v27 = vpop.xlane.xlu1 %317 }
 0x134   : > { %514 = vrsqrt.f32 %v321_v26  ;;  %v320_v28 = vmul.f32 0.0078125, %v318_v27 }
 0x136   : > { %v322_v29 = vadd.f32 1e-05, %v320_v28 }
 0x138   : > { %516 = vrsqrt.f32 %v322_v29 }
 0x141   : > { %v515_v30 = vpop.eup %514 }
 0x142   : > { %v325_v31 = vmul.f32 %v515_v30, %v311_v18 }
 0x144   : > { %v334_v34 = vmul.f32 %v467_v32, %v325_v31 }
 0x145   : > { %v517_v33 = vpop.eup %516 }
 0x146   : > { %v326_v35 = vmul.f32 %v517_v33, %v312_v22  ;;  %v343_v38 = vadd.f32 %v468_v36, %v334_v34 }
 0x148   : > { %v335_v37 = vmul.f32 %v467_v32, %v326_v35 }
 0x14a   : > { %v344_v39 = vadd.f32 %v468_v36, %v335_v37 }
 0x14c   : > { %v488_v40 = vpack.c.bf16 %v344_v39, %v343_v38 }
 0x14e   : > { %489 = vst [vmem:[%s284_s11] sm:$0xff] %v488_v40  }
 0x14f PF: > { %s15_s20 = sadd.s32 1, %s540_s20   ;;  %s630_s18 = smov %s536_s19 }
 0x150   : > { %p12_p5 = scmp.ge.s32.totalorder %s15_s20, 4   ;;  %s631_s19 = smov %s633_s21 }
 0x152   :  { %14 = sbr.rel (!%p12_p5) target bundleno = 2 (0x2), region = 73 }

// kernel: roberta_cor_forward.34
= control target key start
LH: loop header
LB: loop body
LE: loop exit
PB: predicated region body
PF: predicated region fallthrough
CT: control target
= control target key end

     0   :  { %v469_v1 = vmov 0   ;;  %v53_v27 = vlaneseq  ;;  %s595_s1 = inlined_call_operand.vmem [shape: bf16[128,384], index: 1, kind: input, shape index: {}]   ;;  %s596_s0 = inlined_call_operand.vmem [shape: bf16[32,128], index: 0, kind: input, shape index: {}]   ;;  %s597_s2 = inlined_call_operand.vmem [shape: f32[1,384], index: 2, kind: input, shape index: {}]   ;;  %s598_s3 = inlined_call_operand.vmem [shape: bf16[32,384], index: 3, kind: output, shape index: {}]  }
   0x1   :  { %v435_v0 = vld [vmem:[%s595_s1 + $0xac] ss:$12 sps:$4 sm:$0xff]   ;;  %240 = vmatprep.mubr.bf16.mxu0 %v469_v1  ;;  %v437_v2 = vld [vmem:[%s595_s1 + $0xa8] ss:$12 sps:$4 sm:$0xff]   ;;  %v438_v3 = vld [vmem:[%s595_s1 + $0xb0] ss:$12 sps:$4 sm:$0xff]  }
   0x2   :  { %208 = vmatprep.subr.bf16.mxu0 %v435_v0  ;;  %v439_v4 = vld [vmem:[%s595_s1 + $0x94] ss:$12 sps:$4 sm:$0xff]   ;;  %v441_v5 = vld [vmem:[%s595_s1 + $0x90] ss:$12 sps:$4 sm:$0xff]   ;;  %414 = vmatprep.subr.bf16.mxu1 %v438_v3  ;;  %v442_v6 = vld [vmem:[%s595_s1 + $0x98] ss:$12 sps:$4 sm:$0xff]  }
   0x3   :  { %209 = vmatpush1.bf16.msra.mxu0 %v437_v2  ;;  %415 = vmatpush3.bf16.msra.mxu1 %v438_v3  ;;  %v443_v7 = vld [vmem:[%s595_s1 + $0x7c] ss:$12 sps:$4 sm:$0xff]   ;;  %v446_v8 = vld [vmem:[%s595_s1 + $0x80] ss:$12 sps:$4 sm:$0xff]   ;;  %v445_v9 = vld [vmem:[%s595_s1 + $0x78] ss:$12 sps:$4 sm:$0xff]  }
   0x4   :  { %210 = vmatprep.subr.bf16.mxu0 %v439_v4  ;;  %416 = vmatprep.subr.bf16.mxu1 %v442_v6  ;;  %v447_v10 = vld [vmem:[%s595_s1 + $0x64] ss:$12 sps:$4 sm:$0xff]   ;;  %v450_v11 = vld [vmem:[%s595_s1 + $0x68] ss:$12 sps:$4 sm:$0xff]   ;;  %v449_v12 = vld [vmem:[%s595_s1 + $0x60] ss:$12 sps:$4 sm:$0xff]  }
   0x5   :  { %v451_v13 = vld [vmem:[%s595_s1 + $0x4c] ss:$12 sps:$4 sm:$0xff]   ;;  %v454_v14 = vld [vmem:[%s595_s1 + $0x50] ss:$12 sps:$4 sm:$0xff]   ;;  %v453_v15 = vld [vmem:[%s595_s1 + $0x48] ss:$12 sps:$4 sm:$0xff]  }
   0x6   :  { %v455_v16 = vld [vmem:[%s595_s1 + $0x34] ss:$12 sps:$4 sm:$0xff]   ;;  %v457_v17 = vld [vmem:[%s595_s1 + $0x30] ss:$12 sps:$4 sm:$0xff]   ;;  %v458_v18 = vld [vmem:[%s595_s1 + $0x38] ss:$12 sps:$4 sm:$0xff]  }
   0x7   :  { %211 = vmatpush1.bf16.msra.mxu0 %v441_v5  ;;  %417 = vmatpush3.bf16.msra.mxu1 %v442_v6  ;;  %v467_v19 = vld [vmem:[%s596_s0] sm:$0xff]   ;;  %v459_v20 = vld [vmem:[%s595_s1 + $0x1c] ss:$12 sps:$4 sm:$0xff]   ;;  %v54_v28 = vshrl.u32 %v53_v27, 7 }
   0x8   :  { %212 = vmatprep.subr.bf16.mxu0 %v443_v7  ;;  %418 = vmatprep.subr.bf16.mxu1 %v446_v8  ;;  %v462_v21 = vld [vmem:[%s595_s1 + $0x20] ss:$12 sps:$4 sm:$0xff]   ;;  %v461_v22 = vld [vmem:[%s595_s1 + $0x18] ss:$12 sps:$4 sm:$0xff]   ;;  %v466_v24 = vld [vmem:[%s595_s1 + $0x8] ss:$12 sps:$4 sm:$0xff]  }
   0x9   :  { %430 = vmatprep.mubr.bf16.mxu1 %v467_v19  ;;  %v463_v23 = vld [vmem:[%s595_s1 + $0x4] ss:$12 sps:$4 sm:$0xff]   ;;  %v465_v25 = vld [vmem:[%s595_s1] ss:$12 sps:$4 sm:$0xff]   ;;  %v55_v29 = vsub.s32 0, %v54_v28  ;;  %v59_v30 = vsub.s32 1, %v54_v28 }
   0xa   :  { %v468_v26 = vld [vmem:[%s596_s0 + $0x8] sm:$0xff]   ;;  %v63_v31 = vsub.s32 2, %v54_v28  ;;  %v51_v32 = vld [vmem:[%s597_s2] sm:$0x7] }
   0xb   :  { %213 = vmatpush1.bf16.msra.mxu0 %v445_v9  ;;  %419 = vmatpush3.bf16.msra.mxu1 %v446_v8  ;;  %v56_v33 = vrot.slane %v51_v32, %v55_v29  ;;  %v60_v34 = vrot.slane %v51_v32, %v59_v30 }
   0xc   :  { %214 = vmatprep.subr.bf16.mxu0 %v447_v10  ;;  %420 = vmatprep.subr.bf16.mxu1 %v450_v11  ;;  %v64_v35 = vrot.slane %v51_v32, %v63_v31 }
   0xf   :  { %215 = vmatpush1.bf16.msra.mxu0 %v449_v12  ;;  %421 = vmatpush3.bf16.msra.mxu1 %v450_v11 }
  0x10   :  { %216 = vmatprep.subr.bf16.mxu0 %v451_v13  ;;  %422 = vmatprep.subr.bf16.mxu1 %v454_v14 }
  0x13   :  { %217 = vmatpush1.bf16.msra.mxu0 %v453_v15  ;;  %423 = vmatpush3.bf16.msra.mxu1 %v454_v14 }
  0x14   :  { %218 = vmatprep.subr.bf16.mxu0 %v455_v16  ;;  %424 = vmatprep.subr.bf16.mxu1 %v458_v18 }
  0x17   :  { %219 = vmatpush1.bf16.msra.mxu0 %v457_v17  ;;  %425 = vmatpush3.bf16.msra.mxu1 %v458_v18 }
  0x18   :  { %220 = vmatprep.subr.bf16.mxu0 %v459_v20  ;;  %426 = vmatprep.subr.bf16.mxu1 %v462_v21 }
  0x1b   :  { %221 = vmatpush1.bf16.msra.mxu0 %v461_v22  ;;  %427 = vmatpush3.bf16.msra.mxu1 %v462_v21 }
  0x1c   :  { %222 = vmatprep.subr.bf16.mxu0 %v463_v23  ;;  %428 = vmatprep.subr.bf16.mxu1 %v466_v24 }
  0x1f   :  { %223 = vmatpush1.bf16.msra.mxu0 %v465_v25  ;;  %429 = vmatpush3.bf16.msra.mxu1 %v466_v24 }
  0x22   :  { %241 = vmatmul.mubr.bf16.vlgmr.msra.gmra.mxu0 %v467_v19  ;;  %431 = vmatmul.mubr.bf16.vlgmr.msra.gmra.mxu1 %v468_v26 }
  0x23   :  { %250 = vmatprep.mubr.bf16.mxu0 %v469_v1 }
  0x2a   :  { %251 = vmatmul.mubr.bf16.gmra.mxu0 %v468_v26 }
  0xe2   :  { %v242_v36 = vpop.f32.mrf.mxu0  ;;  %v432_v38 = vpop.f32.mrf.mxu1 }
  0xe3   :  { %v243_v39 = vadd.f32 %v242_v36, %v56_v33  ;;  %v304_v41 = vadd.f32 %v432_v38, %v64_v35 }
  0xe4   :  { %v244_v37 = vpop.f32.mrf.mxu0  ;;  %v295_v43 = vpop.f32.mrf.mxu1 }
  0xe5   :  { %v245_v40 = vadd.f32 %v244_v37, %v60_v34  ;;  %v401_v45 = vpack.c.bf16 %v304_v41, %v304_v41  ;;  %v296_v46 = vadd.f32 %v295_v43, %v64_v35 }
  0xe6   :  { %v246_v42 = vpop.f32.mrf.mxu0  ;;  %v433_v48 = vpop.f32.mrf.mxu1 }
  0xe7   :  { %v396_v44 = vpack.c.bf16 %v245_v40, %v243_v39  ;;  %355 = vst [vmem:[%s598_s3 + $0x20] sm:$0xf] %v401_v45  ;;  %v247_v49 = vadd.f32 %v246_v42, %v56_v33  ;;  %v397_v50 = vpack.c.bf16 %v296_v46, %v296_v46  ;;  %v307_v52 = vadd.f32 %v433_v48, %v64_v35 }
  0xe8   :  { %v248_v47 = vpop.f32.mrf.mxu0  ;;  %v298_v54 = vpop.f32.mrf.mxu1 }
  0xe9   :  { %350 = vst [vmem:[%s598_s3] sm:$0xff] %v396_v44  ;;  %v249_v51 = vadd.f32 %v248_v47, %v60_v34  ;;  %351 = vst [vmem:[%s598_s3 + $0x8] sm:$0xf] %v397_v50  ;;  %v403_v56 = vpack.c.bf16 %v307_v52, %v307_v52  ;;  %v299_v57 = vadd.f32 %v298_v54, %v64_v35 }
  0xea   :  { %v252_v53 = vpop.f32.mrf.mxu0 }
  0xeb   :  { %v398_v55 = vpack.c.bf16 %v249_v51, %v247_v49  ;;  %357 = vst [vmem:[%s598_s3 + $0x2c] sm:$0xf] %v403_v56  ;;  %v253_v59 = vadd.f32 %v252_v53, %v56_v33  ;;  %v399_v60 = vpack.c.bf16 %v299_v57, %v299_v57 }
  0xec   :  { %v254_v58 = vpop.f32.mrf.mxu0 }
  0xed   :  { %352 = vst [vmem:[%s598_s3 + $0xc] sm:$0xff] %v398_v55  ;;  %v255_v61 = vadd.f32 %v254_v58, %v60_v34  ;;  %353 = vst [vmem:[%s598_s3 + $0x14] sm:$0xf] %v399_v60 }
  0xee   :  { %v256_v62 = vpop.f32.mrf.mxu0 }
  0xef   :  { %v400_v63 = vpack.c.bf16 %v255_v61, %v253_v59  ;;  %v257_v1 = vadd.f32 %v256_v62, %v56_v33 }
  0xf0   :  { %v258_v0 = vpop.f32.mrf.mxu0 }
  0xf1   :  { %354 = vst [vmem:[%s598_s3 + $0x18] sm:$0xff] %v400_v63  ;;  %v259_v2 = vadd.f32 %v258_v0, %v60_v34 }
  0xf3   :  { %v402_v3 = vpack.c.bf16 %v259_v2, %v257_v1 }
  0xf5   :  { %356 = vst [vmem:[%s598_s3 + $0x24] sm:$0xff] %v402_v3 }

// kernel: roberta_cor_forward.36
= control target key start
LH: loop header
LB: loop body
LE: loop exit
PB: predicated region body
PF: predicated region fallthrough
CT: control target
= control target key end

     0   :  { %s438_s1 = inlined_call_operand.vmem [shape: bf16[128,128], index: 1, kind: input, shape index: {}]   ;;  %s439_s0 = inlined_call_operand.vmem [shape: bf16[32,128], index: 0, kind: input, shape index: {}]   ;;  %s440_s3 = inlined_call_operand.vmem [shape: bf16[32,128], index: 3, kind: input, shape index: {}]   ;;  %s441_s2 = inlined_call_operand.vmem [shape: f32[1,128], index: 2, kind: input, shape index: {}]   ;;  %s442_s4 = inlined_call_operand.vmem [shape: f32[1,128], index: 4, kind: input, shape index: {}]   ;;  %s443_s5 = inlined_call_operand.vmem [shape: f32[1,128], index: 5, kind: input, shape index: {}]   ;;  %s444_s6 = inlined_call_operand.vmem [shape: bf16[32,128], index: 6, kind: output, shape index: {}]  }
   0x1   :  { %v334_v0 = vld [vmem:[%s438_s1 + $0x38] sm:$0xff]   ;;  %v335_v1 = vld [vmem:[%s438_s1 + $0x30] sm:$0xff]   ;;  %v336_v2 = vld [vmem:[%s438_s1 + $0x28] sm:$0xff]  }
   0x2   :  { %314 = vmatprep.subr.bf16.mxu0 %v334_v0  ;;  %v337_v3 = vld [vmem:[%s438_s1 + $0x20] sm:$0xff]   ;;  %v338_v5 = vld [vmem:[%s438_s1 + $0x18] sm:$0xff]   ;;  %v339_v6 = vld [vmem:[%s438_s1 + $0x10] sm:$0xff]  }
   0x3   :  { %315 = vmatpush3.bf16.msra.mxu0 %v334_v0  ;;  %v342_v4 = vld [vmem:[%s439_s0] sm:$0xff]   ;;  %v340_v7 = vld [vmem:[%s438_s1 + $0x8] sm:$0xff]  }
   0x4   :  { %316 = vmatprep.subr.bf16.mxu0 %v335_v1  ;;  %330 = vmatprep.mubr.bf16.mxu0 %v342_v4  ;;  %v341_v8 = vld [vmem:[%s438_s1] sm:$0xff]   ;;  %v343_v9 = vld [vmem:[%s439_s0 + $0x8] sm:$0xff]  }
   0x5   :  { %v302_v10 = vld [vmem:[%s440_s3 + $0x8] sm:$0xff]   ;;  %v263_v11 = vld [vmem:[%s441_s2] ss:$0 sm:$0xff] }
   0x6   :  { %v285_v12 = vld [vmem:[%s440_s3] sm:$0xff]   ;;  %v290_v13 = vunpack.c.l.bf16 %v302_v10  ;;  %v291_v20 = vunpack.c.h.bf16 %v302_v10 }
   0x7   :  { %317 = vmatpush3.bf16.msra.mxu0 %v335_v1  ;;  %v286_v16 = vunpack.c.l.bf16 %v285_v12  ;;  %v287_v24 = vunpack.c.h.bf16 %v285_v12  ;;  %v274_v59 = vld [vmem:[%s442_s4] ss:$0 sm:$0xff] }
   0x8   :  { %318 = vmatprep.subr.bf16.mxu0 %v336_v2  ;;  %v275_v0 = vld [vmem:[%s443_s5] ss:$0 sm:$0xff] }
   0xb   :  { %319 = vmatpush3.bf16.msra.mxu0 %v336_v2 }
   0xc   :  { %320 = vmatprep.subr.bf16.mxu0 %v337_v3 }
   0xf   :  { %321 = vmatpush3.bf16.msra.mxu0 %v337_v3 }
  0x10   :  { %322 = vmatprep.subr.bf16.mxu0 %v338_v5 }
  0x13   :  { %323 = vmatpush3.bf16.msra.mxu0 %v338_v5 }
  0x14   :  { %324 = vmatprep.subr.bf16.mxu0 %v339_v6 }
  0x17   :  { %325 = vmatpush3.bf16.msra.mxu0 %v339_v6 }
  0x18   :  { %326 = vmatprep.subr.bf16.mxu0 %v340_v7 }
  0x1b   :  { %327 = vmatpush3.bf16.msra.mxu0 %v340_v7 }
  0x1c   :  { %328 = vmatprep.subr.bf16.mxu0 %v341_v8 }
  0x1f   :  { %329 = vmatpush3.bf16.msra.mxu0 %v341_v8 }
  0x22   :  { %331 = vmatmul.mubr.bf16.vlgmr.msra.gmra.mxu0 %v343_v9 }
  0xe2   :  { %v332_v14 = vpop.f32.mrf.mxu0 }
  0xe3   :  { %v154_v15 = vadd.f32 %v332_v14, %v263_v11 }
  0xe4   :  { %v145_v17 = vpop.f32.mrf.mxu0 }
  0xe5   :  { %v146_v18 = vadd.f32 %v263_v11, %v145_v17  ;;  %v170_v19 = vadd.f32 %v290_v13, %v154_v15 }
  0xe6   :  { %v333_v21 = vpop.f32.mrf.mxu0 }
  0xe7   :  { %v157_v22 = vadd.f32 %v333_v21, %v263_v11  ;;  %176 = vadd.xlane.f32.xlu1 %v170_v19  ;;  %v168_v23 = vadd.f32 %v286_v16, %v146_v18 }
  0xe8   :  { %v148_v25 = vpop.f32.mrf.mxu0 }
  0xe9   :  { %v149_v26 = vadd.f32 %v263_v11, %v148_v25  ;;  %172 = vadd.xlane.f32.xlu0 %v168_v23  ;;  %v171_v27 = vadd.f32 %v291_v20, %v157_v22 }
  0xeb   :  { %178 = vadd.xlane.f32.xlu1 %v171_v27  ;;  %v169_v28 = vadd.f32 %v287_v24, %v149_v26 }
  0xed   :  { %174 = vadd.xlane.f32.xlu0 %v169_v28 }
 0x170   :  { %v177_v29 = vpop.xlane.xlu1 %176 }
 0x171   :  { %v183_v31 = vmul.f32 0.0078125, %v177_v29 }
 0x172   :  { %v173_v30 = vpop.xlane.xlu0 %172 }
 0x173   :  { %v181_v32 = vmul.f32 0.0078125, %v173_v30  ;;  %v187_v36 = vsub.f32 %v170_v19, %v183_v31 }
 0x174   :  { %v179_v33 = vpop.xlane.xlu1 %178 }
 0x175   :  { %v185_v34 = vsub.f32 %v168_v23, %v181_v32  ;;  %v184_v37 = vmul.f32 0.0078125, %v179_v33  ;;  %v191_v42 = vmul.f32 %v187_v36, %v187_v36 }
 0x176   :  { %v175_v35 = vpop.xlane.xlu0 %174 }
 0x177   :  { %v182_v38 = vmul.f32 0.0078125, %v175_v35  ;;  %v189_v39 = vmul.f32 %v185_v34, %v185_v34  ;;  %v188_v41 = vsub.f32 %v171_v27, %v184_v37 }
 0x179   :  { %v186_v40 = vsub.f32 %v169_v28, %v182_v38  ;;  %193 = vadd.xlane.f32.xlu0 %v189_v39  ;;  %v192_v44 = vmul.f32 %v188_v41, %v188_v41 }
 0x17b   :  { %v190_v43 = vmul.f32 %v186_v40, %v186_v40 }
 0x17d   :  { %197 = vadd.xlane.f32.xlu0 %v191_v42  ;;  %195 = vadd.xlane.f32.xlu1 %v190_v43 }
 0x181   :  { %199 = vadd.xlane.f32.xlu1 %v192_v44 }
 0x202   :  { %v194_v45 = vpop.xlane.xlu0 %193 }
 0x203   :  { %v201_v46 = vmul.f32 0.0078125, %v194_v45 }
 0x205   :  { %v205_v47 = vadd.f32 1e-05, %v201_v46 }
 0x206   :  { %v196_v48 = vpop.xlane.xlu1 %195  ;;  %v198_v49 = vpop.xlane.xlu0 %197 }
 0x207   :  { %344 = vrsqrt.f32 %v205_v47  ;;  %v202_v50 = vmul.f32 0.0078125, %v196_v48  ;;  %v203_v51 = vmul.f32 0.0078125, %v198_v49 }
 0x209   :  { %v206_v52 = vadd.f32 1e-05, %v202_v50  ;;  %v207_v53 = vadd.f32 1e-05, %v203_v51 }
 0x20a   :  { %v200_v54 = vpop.xlane.xlu1 %199 }
 0x20b   :  { %346 = vrsqrt.f32 %v206_v52  ;;  %v204_v55 = vmul.f32 0.0078125, %v200_v54 }
 0x20c   :  { %348 = vrsqrt.f32 %v207_v53 }
 0x20d   :  { %v208_v56 = vadd.f32 1e-05, %v204_v55 }
 0x20f   :  { %350 = vrsqrt.f32 %v208_v56 }
 0x214   :  { %v345_v57 = vpop.eup %344 }
 0x215   :  { %v213_v58 = vmul.f32 %v345_v57, %v185_v34 }
 0x217   :  { %v224_v62 = vmul.f32 %v274_v59, %v213_v58 }
 0x218   :  { %v347_v60 = vpop.eup %346 }
 0x219   :  { %v349_v61 = vpop.eup %348  ;;  %v214_v63 = vmul.f32 %v347_v60, %v186_v40  ;;  %v235_v4 = vadd.f32 %v275_v0, %v224_v62 }
 0x21a   :  { %v215_v1 = vmul.f32 %v349_v61, %v187_v36 }
 0x21b   :  { %v225_v2 = vmul.f32 %v274_v59, %v214_v63 }
 0x21c   :  { %v351_v3 = vpop.eup %350  ;;  %v226_v6 = vmul.f32 %v274_v59, %v215_v1 }
 0x21d   :  { %v236_v5 = vadd.f32 %v275_v0, %v225_v2  ;;  %v216_v7 = vmul.f32 %v351_v3, %v188_v41 }
 0x21e   :  { %v237_v10 = vadd.f32 %v275_v0, %v226_v6 }
 0x21f   :  { %v295_v8 = vpack.c.bf16 %v236_v5, %v235_v4  ;;  %v227_v9 = vmul.f32 %v274_v59, %v216_v7 }
 0x221   :  { %296 = vst [vmem:[%s444_s6] sm:$0xff] %v295_v8   ;;  %v238_v11 = vadd.f32 %v275_v0, %v227_v9 }
 0x223   :  { %v300_v12 = vpack.c.bf16 %v238_v11, %v237_v10 }
 0x225   :  { %303 = vst [vmem:[%s444_s6 + $0x8] sm:$0xff] %v300_v12  }

// kernel: roberta_cor_forward.35
= control target key start
LH: loop header
LB: loop body
LE: loop exit
PB: predicated region body
PF: predicated region fallthrough
CT: control target
= control target key end

     0   :  { %s1410_s15 = smov 0   ;;  %s1412_s16 = smov 0   ;;  %s1596_s0 = inlined_call_operand.vmem [shape: bf16[2,16,384], index: 0, kind: input, shape index: {}, may-alias: {0,1,2}]   ;;  %s1597_s1 = inlined_call_operand.vmem [shape: bf16[2,16,384], index: 1, kind: input, shape index: {}, may-alias: {0,1,2}]   ;;  %s1598_s2 = inlined_call_operand.vmem [shape: bf16[2,16,384], index: 2, kind: input, shape index: {}, may-alias: {0,1,2}]   ;;  %s1599_s3 = inlined_call_operand.vmem [shape: f32[2,1,16], index: 3, kind: input, shape index: {}]   ;;  %s1600_s4 = inlined_call_operand.vmem [shape: bf16[2,16,128], index: 4, kind: output, shape index: {}]  }
   0x1   :  { %s1414_s17 = smov 0   ;;  %s1416_s18 = smov 0  }
   0x2   :  { %s1418_s19 = smov 0  }
   0x3 LB: > { %s26_s20 = sadd.s32 1, %s1374_s18  ;;  %p42_p1 = scmp.ne.s32.totalorder %s1366_s16, %s1362_s15  ;;  %s1378_s19 = sphi %s1418_s19, %s14_s19   ;;  %s1374_s18 = sphi %s1416_s18, %s1605_s18   ;;  %s1370_s17 = sphi %s1414_s17, %s1604_s17   ;;  %s1366_s16 = sphi %s1412_s16, %s1603_s16   ;;  %s1362_s15 = sphi %s1410_s15, %s1602_s15  }
   0x4   : > { %p28_p0 = scmp.ge.s32.totalorder %s26_s20, 2  ;;  %p43_p2 = scmp.eq.s32.totalorder %s1378_s19, 0 }
   0x5   : > { %s35_s23 = sadd.s32 1, %s1366_s16  ;;  %p1139_p5 = scmp.ge.s32.totalorder %s1378_s19, 2 }
   0x6   : > { %s1607_s20 = smov (%p28_p0, %s26_s20), 0  ;;  %p1441_p3 = por %p43_p2, %p42_p1 }
   0x7   : > { %s30_s22 = ssub.s32 %s1374_s18, %s1607_s20  ;;  %182 = sbr.rel (%p1139_p5) target bundleno = 30 (0x1e), region = 16 }
   0x8   : > { %p33_p4 = scmp.eq.s32.totalorder %s30_s22, 0 }
   0xa   : > { %s1449_s24 = scalar_select %p33_p4, %s1366_s16, %s35_s23  }
   0xc   : > { %185 = sbr.rel (!%p1441_p3) target bundleno = 18 (0x12), region = 20  ;;  %s187_s25 = sand.u32 (%p1441_p3), 1, %s1366_s16  }
   0xd   : > { %s1244_s26 = smul.u32 (%p1441_p3), 24, %s1374_s18  ;;  %s1140_s27 = sshll.u32 (%p1441_p3), %s187_s25, 3 }
   0xe   : > { %s189_s5 = scalar_lea.vmem (%p1441_p3), [#allocation2], %s1140_s27 }
   0xf   : > { %s193_s30 = scalar_lea.vmem (%p1441_p3), %s1596_s0, %s1244_s26 }
  0x10   : > { %v210_v0 = vld [vmem:[%s193_s30] sm:$0xf] (%p1441_p3)  ;;  %v212_v1 = vld [vmem:[%s193_s30 + $0xc] sm:$0xf] (%p1441_p3) }
  0x11   : > { %211 = vst [vmem:[%s189_s5] sm:$0xf] %v210_v0  ;;  %213 = vst [vmem:[%s189_s5 + $0x4] sm:$0xf] %v212_v1 }
  0x12 PF: > { %241 = sbr.rel (!%p1441_p3) target bundleno = 24 (0x18), region = 61  ;;  %s243_s6 = sand.u32 (%p1441_p3), 1, %s1366_s16  }
  0x13   : > { %s1143_s7 = smul.u32 (%p1441_p3), 24, %s1374_s18  ;;  %s1142_s8 = sshll.u32 (%p1441_p3), %s243_s6, 3 }
  0x14   : > { %s245_s12 = scalar_lea.vmem (%p1441_p3), [#allocation3], %s1142_s8 }
  0x15   : > { %s1038_s11 = scalar_lea.vmem (%p1441_p3), %s1597_s1, %s1143_s7 }
  0x16   : > { %v1144_v2 = vld [vmem:[%s1038_s11 + $0x4] sm:$0xf] (%p1441_p3)  ;;  %v1145_v3 = vld [vmem:[%s1038_s11 + $0x10] sm:$0xf] (%p1441_p3) }
  0x17   : > { %268 = vst [vmem:[%s245_s12] sm:$0xf] %v1144_v2  ;;  %270 = vst [vmem:[%s245_s12 + $0x4] sm:$0xf] %v1145_v3 }
  0x18 PF: > { %298 = sbr.rel (!%p1441_p3) target bundleno = 30 (0x1e), region = 102  ;;  %s300_s13 = sand.u32 (%p1441_p3), 1, %s1366_s16  }
  0x19   : > { %s1147_s14 = smul.u32 (%p1441_p3), 24, %s1374_s18  ;;  %s1146_s22 = sshll.u32 (%p1441_p3), %s300_s13, 3 }
  0x1a   : > { %s302_s27 = scalar_lea.vmem (%p1441_p3), [#allocation4], %s1146_s22 }
  0x1b   : > { %s1045_s26 = scalar_lea.vmem (%p1441_p3), %s1598_s2, %s1147_s14 }
  0x1c   : > { %v1148_v4 = vld [vmem:[%s1045_s26 + $0x8] sm:$0xf] (%p1441_p3)  ;;  %v1149_v5 = vld [vmem:[%s1045_s26 + $0x14] sm:$0xf] (%p1441_p3) }
  0x1d   : > { %325 = vst [vmem:[%s302_s27] sm:$0xf] %v1148_v4  ;;  %327 = vst [vmem:[%s302_s27 + $0x4] sm:$0xf] %v1149_v5 }
  0x1e PF: > { %p1150_p6 = scmp.ge.s32.totalorder %s1378_s19, 1  ;;  %p360_p7 = scmp.lt.s32.totalorder %s1378_s19, 3 }
  0x20   : > { %p361_p8 = pnand %p1150_p6, %p360_p7 }
  0x21   : > { %s367_s21 = sand.u32 (!%p361_p8), 1, %s1362_s15   ;;  %p422_p9 = scmp.lt.s32.totalorder (!%p361_p8), %s1370_s17, 1 }
  0x22   : > { %364 = sbr.rel (%p361_p8) target bundleno = 1468 (0x5bc), region = 147  ;;  %s1477_s28 = sshll.u32 (!%p361_p8), %s367_s21, 3 }
  0x23   : > { %s376_s15 = scalar_lea.vmem (!%p361_p8), [#allocation3], %s1477_s28  ;;  %s369_s29 = scalar_lea.vmem (!%p361_p8), [#allocation2], %s1477_s28 }
  0x24   : > { %s1382_s7 = smov (!%p361_p8), 96   ;;  %s1383_s8 = smov (!%p361_p8), 32  }
  0x25   : > { %s383_s9 = scalar_lea.vmem (!%p361_p8), [#allocation4], %s1477_s28  ;;  %s1384_s10 = smov (!%p361_p8), 64  }
  0x27   : > { %v1380_v6 = vmov 0.0   ;;  %vm1381_vm0 = vmmov 0   ;;  %vm451_vm1 = vcmask 261120   ;;  %v1305_v7 = vld [vmem:[%s376_s15] sm:$0xff]   ;;  %v1306_v9 = vld [vmem:[%s369_s29] sm:$0xff]   ;;  %s1609_s17 = smov (!%p422_p9, %s1370_s17), 1 }
  0x28   : > { %1196 = vmatprep.subr.bf16.mxu0 %v1380_v6  ;;  %1198 = vmatprep.mubr.msk.bf16.mxu0 %vm1381_vm0, %v1380_v6  ;;  %v456_v8 = vsel %vm451_vm1, %v1305_v7, 0  ;;  %s424_s6 = scalar_lea.vmem %s1599_s3, %s1609_s17  ;;  %vm509_vm2 = vcmask 130048   ;;  %v1510_v31 = vld [vmem:[%s383_s9] sm:$0xff]   ;;  %vm984_vm3 = vcmask 523264   ;;  %s1172_s11 = sshll.u32 %s1609_s17, 3  ;;  %vm987_vm4 = vcmask 785408  }
  0x29   : > { %1202 = vmatprep.subr.bf16.mxu1 %v1380_v6  ;;  %1204 = vmatprep.mubr.msk.bf16.mxu1 %vm1381_vm0, %v1380_v6  ;;  %v1499_v11 = vld [vmem:[%s424_s6] ss:$0 sm:$0xff]  ;;  %s432_s14 = scalar_lea.vmem %s1600_s4, %s1172_s11 }
  0x2a   : > { %1197 = vmatpush3.bf16.xpose.msra.mxu0 %v456_v8  ;;  %1203 = vmatpush3.bf16.msra.mxu1 %v1510_v31 }
  0x2b   : > { %1214 = vmatprep.subr.bf16.mxu0 %v1380_v6  ;;  %1208 = vmatprep.subr.bf16.mxu1 %v1380_v6 }
  0x31   : > { %1199 = vmatmul.mubr.msk.bf16.vlgmr.msra.gmra.mxu0 %vm451_vm1, %v1306_v9 }
  0x32   : > { %1216 = vmatprep.mubr.msk.bf16.mxu0 %vm1381_vm0, %v1380_v6 }
  0xf1   : > { %v492_v10 = vpop.f32.mrf.mxu0 }
  0xf2   : > { %v499_v12 = vmul.f32 0.17677669, %v492_v10 }
  0xf3   : > { %v1200_v13 = vpop.f32.mrf.mxu0 }
  0xf4   : > { %v507_v14 = vadd.f32 %v1499_v11, %v499_v12 }
  0xf5   : > { %v495_v15 = vpop.f32.mrf.mxu0 }
  0xf6   : > { %v500_v16 = vmul.f32 0.17677669, %v495_v15  ;;  %v510_v17 = vsel %vm509_vm2, %v507_v14, -inf }
  0xf7   : > { %511 = vmax.xlane.f32.xlu0 %v510_v17  ;;  %v1201_v18 = vpop.f32.mrf.mxu0 }
  0xf8   : > { %v508_v19 = vadd.f32 %v1499_v11, %v500_v16 }
  0xfa   : > { %v513_v20 = vsel %vm509_vm2, %v508_v19, -inf }
  0xfb   : > { %514 = vmax.xlane.f32.xlu0 %v513_v20 }
 0x111   : > { %585 = vrot.lane.b32.xlu0 %v1305_v7, %s1382_s7 }
 0x115   : > { %835 = vrot.lane.b32.xlu0 %v1305_v7, %s1383_s8 }
 0x180   : > { %v512_v21 = vpop.xlane.xlu0 %511 }
 0x181   : > { %v516_v22 = vsub.f32 %v507_v14, %v512_v21 }
 0x183   : > { %v518_v23 = vmul.f32 1.442695, %v516_v22 }
 0x184   : > { %v515_v24 = vpop.xlane.xlu0 %514 }
 0x185   : > { %1308 = vpow2.f32 %v518_v23  ;;  %v517_v25 = vsub.f32 %v508_v19, %v515_v24 }
 0x187   : > { %v520_v26 = vmul.f32 1.442695, %v517_v25 }
 0x188   : > { %v586_v36 = vpop.permute.xlu0 %585 }
 0x189   : > { %1310 = vpow2.f32 %v520_v26  ;;  %v591_v40 = vsel %vm451_vm1, %v586_v36, 0 }
 0x18c   : > { %v836_v44 = vpop.permute.xlu0 %835 }
 0x18d   : > { %v841_v46 = vsel %vm451_vm1, %v836_v44, 0 }
 0x192   : > { %v1309_v27 = vpop.eup %1308 }
 0x193   : > { %v522_v28 = vsel %vm509_vm2, %v1309_v27, 0.0 }
 0x194   : > { %523 = vadd.xlane.f32.xlu1 %v522_v28 }
 0x196   : > { %v1311_v29 = vpop.eup %1310 }
 0x197   : > { %v525_v30 = vsel %vm509_vm2, %v1311_v29, 0.0 }
 0x198   : > { %526 = vadd.xlane.f32.xlu1 %v525_v30 }
 0x1a9   : > { %583 = vrot.lane.b32.xlu1 %v1306_v9, %s1382_s7 }
 0x1ad   : > { %710 = vrot.lane.b32.xlu1 %v1305_v7, %s1384_s10 }
 0x1b1   : > { %708 = vrot.lane.b32.xlu1 %v1306_v9, %s1384_s10 }
 0x1b5   : > { %833 = vrot.lane.b32.xlu1 %v1306_v9, %s1383_s8 }
 0x21d   : > { %v524_v32 = vpop.xlane.xlu1 %523 }
 0x21e   : > { %1312 = vrcp.f32 %v524_v32 }
 0x221   : > { %v527_v33 = vpop.xlane.xlu1 %526 }
 0x222   : > { %1314 = vrcp.f32 %v527_v33 }
 0x225   : > { %v584_v39 = vpop.permute.xlu1 %583 }
 0x229   : > { %v711_v42 = vpop.permute.xlu1 %710 }
 0x22a   : > { %v716_v43 = vsel %vm451_vm1, %v711_v42, 0 }
 0x22b   : > { %v1313_v34 = vpop.eup %1312 }
 0x22c   : > { %v530_v37 = vmul.f32 %v1313_v34, %v1309_v27 }
 0x22d   : > { %v709_v45 = vpop.permute.xlu1 %708 }
 0x22f   : > { %v1315_v35 = vpop.eup %1314 }
 0x230   : > { %v531_v38 = vmul.f32 %v1315_v35, %v1311_v29 }
 0x231   : > { %v834_v47 = vpop.permute.xlu1 %833 }
 0x232   : > { %v532_v41 = vpack.c.bf16 %v531_v38, %v530_v37 }
 0x234   : > { %1205 = vmatmul.mubr.msk.bf16.vlgmr.msra.gmra.mxu1 %vm509_vm2, %v532_v41 }
 0x235   : > { %1209 = vmatpush3.bf16.xpose.msra.mxu1 %v591_v40  ;;  %1210 = vmatprep.mubr.msk.bf16.mxu1 %vm1381_vm0, %v1380_v6 }
 0x236   : > { %1220 = vmatprep.subr.bf16.mxu1 %v1380_v6 }
 0x23c   : > { %1211 = vmatmul.mubr.msk.bf16.vlgmr.msra.gmra.mxu1 %vm451_vm1, %v584_v39 }
 0x23d   : > { %1221 = vmatpush3.bf16.xpose.msra.mxu1 %v716_v43  ;;  %1222 = vmatprep.mubr.msk.bf16.mxu1 %vm1381_vm0, %v1380_v6 }
 0x23e   : > { %1232 = vmatprep.subr.bf16.mxu1 %v1380_v6 }
 0x244   : > { %1223 = vmatmul.mubr.msk.bf16.vlgmr.msra.gmra.mxu1 %vm451_vm1, %v709_v45 }
 0x245   : > { %1233 = vmatpush3.bf16.xpose.msra.mxu1 %v841_v46  ;;  %1234 = vmatprep.mubr.msk.bf16.mxu1 %vm1381_vm0, %v1380_v6 }
 0x24c   : > { %1235 = vmatmul.mubr.msk.bf16.vlgmr.msra.gmra.mxu1 %vm451_vm1, %v834_v47 }
 0x2f4   : > { %v1533_v48 = vpop.f32.mrf.mxu1 }
 0x2f6   : > { %v1206_v49 = vpop.f32.mrf.mxu1 }
 0x2f8   : > { %v1535_v50 = vpop.f32.mrf.mxu1 }
 0x2fa   : > { %v1207_v51 = vpop.f32.mrf.mxu1 }
 0x2fc   : > { %v627_v52 = vpop.f32.mrf.mxu1 }
 0x2fd   : > { %v634_v53 = vmul.f32 0.17677669, %v627_v52 }
 0x2fe   : > { %v1212_v54 = vpop.f32.mrf.mxu1 }
 0x2ff   : > { %v636_v55 = vadd.f32 %v1499_v11, %v634_v53 }
 0x300   : > { %v630_v56 = vpop.f32.mrf.mxu1 }
 0x301   : > { %v635_v57 = vmul.f32 0.17677669, %v630_v56  ;;  %v638_v58 = vsel %vm509_vm2, %v636_v55, -inf }
 0x302   : > { %639 = vmax.xlane.f32.xlu0 %v638_v58  ;;  %v1213_v59 = vpop.f32.mrf.mxu1 }
 0x303   : > { %v637_v60 = vadd.f32 %v1499_v11, %v635_v57 }
 0x304   : > { %v752_v61 = vpop.f32.mrf.mxu1 }
 0x305   : > { %v759_v62 = vmul.f32 0.17677669, %v752_v61  ;;  %v641_v63 = vsel %vm509_vm2, %v637_v60, -inf }
 0x306   : > { %642 = vmax.xlane.f32.xlu1 %v641_v63  ;;  %v1224_v0 = vpop.f32.mrf.mxu1 }
 0x307   : > { %v761_v1 = vadd.f32 %v1499_v11, %v759_v62 }
 0x308   : > { %v755_v2 = vpop.f32.mrf.mxu1 }
 0x309   : > { %v760_v3 = vmul.f32 0.17677669, %v755_v2  ;;  %v763_v4 = vsel %vm509_vm2, %v761_v1, -inf }
 0x30a   : > { %764 = vmax.xlane.f32.xlu0 %v763_v4  ;;  %v1225_v5 = vpop.f32.mrf.mxu1 }
 0x30b   : > { %v762_v7 = vadd.f32 %v1499_v11, %v760_v3 }
 0x30c   : > { %v877_v8 = vpop.f32.mrf.mxu1 }
 0x30d   : > { %v884_v9 = vmul.f32 0.17677669, %v877_v8  ;;  %v766_v10 = vsel %vm509_vm2, %v762_v7, -inf }
 0x30e   : > { %767 = vmax.xlane.f32.xlu0 %v766_v10  ;;  %v1236_v12 = vpop.f32.mrf.mxu1 }
 0x30f   : > { %v886_v13 = vadd.f32 %v1499_v11, %v884_v9 }
 0x310   : > { %v880_v14 = vpop.f32.mrf.mxu1 }
 0x311   : > { %v885_v15 = vmul.f32 0.17677669, %v880_v14  ;;  %v888_v16 = vsel %vm509_vm2, %v886_v13, -inf }
 0x312   : > { %889 = vmax.xlane.f32.xlu0 %v888_v16  ;;  %v1237_v17 = vpop.f32.mrf.mxu1 }
 0x313   : > { %v887_v18 = vadd.f32 %v1499_v11, %v885_v15 }
 0x315   : > { %v891_v19 = vsel %vm509_vm2, %v887_v18, -inf }
 0x316   : > { %892 = vmax.xlane.f32.xlu1 %v891_v19 }
 0x38b   : > { %v640_v20 = vpop.xlane.xlu0 %639 }
 0x38c   : > { %v644_v21 = vsub.f32 %v636_v55, %v640_v20 }
 0x38e   : > { %v646_v22 = vmul.f32 1.442695, %v644_v21 }
 0x38f   : > { %v643_v23 = vpop.xlane.xlu1 %642 }
 0x390   : > { %1316 = vpow2.f32 %v646_v22  ;;  %v645_v24 = vsub.f32 %v637_v60, %v643_v23 }
 0x392   : > { %v648_v25 = vmul.f32 1.442695, %v645_v24 }
 0x393   : > { %v765_v26 = vpop.xlane.xlu0 %764 }
 0x394   : > { %1318 = vpow2.f32 %v648_v25  ;;  %v769_v27 = vsub.f32 %v761_v1, %v765_v26 }
 0x396   : > { %v771_v28 = vmul.f32 1.442695, %v769_v27 }
 0x397   : > { %v768_v29 = vpop.xlane.xlu0 %767 }
 0x398   : > { %1320 = vpow2.f32 %v771_v28  ;;  %v770_v30 = vsub.f32 %v762_v7, %v768_v29 }
 0x39a   : > { %v773_v32 = vmul.f32 1.442695, %v770_v30 }
 0x39b   : > { %v890_v33 = vpop.xlane.xlu0 %889 }
 0x39c   : > { %1322 = vpow2.f32 %v773_v32  ;;  %v894_v11 = vsub.f32 %v886_v13, %v890_v33 }
 0x39d   : > { %v1317_v34 = vpop.eup %1316 }
 0x39e   : > { %v896_v35 = vmul.f32 1.442695, %v894_v11  ;;  %v650_v36 = vsel %vm509_vm2, %v1317_v34, 0.0 }
 0x39f   : > { %651 = vadd.xlane.f32.xlu0 %v650_v36  ;;  %v893_v45 = vpop.xlane.xlu1 %892 }
 0x3a0   : > { %1324 = vpow2.f32 %v896_v35  ;;  %v895_v46 = vsub.f32 %v887_v18, %v893_v45 }
 0x3a1   : > { %v1319_v37 = vpop.eup %1318 }
 0x3a2   : > { %v653_v38 = vsel %vm509_vm2, %v1319_v37, 0.0  ;;  %v898_v47 = vmul.f32 1.442695, %v895_v46 }
 0x3a3   : > { %654 = vadd.xlane.f32.xlu1 %v653_v38 }
 0x3a4   : > { %1326 = vpow2.f32 %v898_v47 }
 0x3a5   : > { %v1321_v39 = vpop.eup %1320 }
 0x3a6   : > { %v775_v40 = vsel %vm509_vm2, %v1321_v39, 0.0 }
 0x3a7   : > { %776 = vadd.xlane.f32.xlu0 %v775_v40 }
 0x3a9   : > { %v1323_v41 = vpop.eup %1322 }
 0x3aa   : > { %v778_v42 = vsel %vm509_vm2, %v1323_v41, 0.0 }
 0x3ab   : > { %779 = vadd.xlane.f32.xlu1 %v778_v42 }
 0x3ad   : > { %v1325_v43 = vpop.eup %1324 }
 0x3ae   : > { %v900_v44 = vsel %vm509_vm2, %v1325_v43, 0.0 }
 0x3af   : > { %901 = vadd.xlane.f32.xlu0 %v900_v44 }
 0x3b1   : > { %v1327_v49 = vpop.eup %1326 }
 0x3b2   : > { %v903_v51 = vsel %vm509_vm2, %v1327_v49, 0.0 }
 0x3bc   : > { %786 = vrot.lane.b32.xlu1 %v1510_v31, %s1384_s10 }
 0x3c5   : > { %661 = vrot.lane.b32.xlu0 %v1510_v31, %s1382_s7 }
 0x3e0   : > { %904 = vadd.xlane.f32.xlu1 %v903_v51 }
 0x3f1   : > { %911 = vrot.lane.b32.xlu1 %v1510_v31, %s1383_s8 }
 0x428   : > { %v652_v52 = vpop.xlane.xlu0 %651 }
 0x429   : > { %1328 = vrcp.f32 %v652_v52 }
 0x42c   : > { %v655_v53 = vpop.xlane.xlu1 %654 }
 0x42d   : > { %1330 = vrcp.f32 %v655_v53 }
 0x430   : > { %v777_v54 = vpop.xlane.xlu0 %776 }
 0x431   : > { %1332 = vrcp.f32 %v777_v54 }
 0x434   : > { %v780_v55 = vpop.xlane.xlu1 %779 }
 0x435   : > { %1334 = vrcp.f32 %v780_v55 }
 0x436   : > { %v1329_v56 = vpop.eup %1328 }
 0x437   : > { %v658_v59 = vmul.f32 %v1329_v56, %v1317_v34 }
 0x438   : > { %v902_v57 = vpop.xlane.xlu0 %901  ;;  %v787_v31 = vpop.permute.xlu1 %786 }
 0x439   : > { %1336 = vrcp.f32 %v902_v57 }
 0x43a   : > { %v1331_v58 = vpop.eup %1330 }
 0x43b   : > { %v659_v60 = vmul.f32 %v1331_v58, %v1319_v37 }
 0x43c   : > { %v662_v61 = vpop.permute.xlu0 %661 }
 0x43d   : > { %1215 = vmatpush3.bf16.msra.mxu0 %v662_v61  ;;  %v660_v62 = vpack.c.bf16 %v659_v60, %v658_v59 }
 0x43e   : > { %1226 = vmatprep.subr.bf16.mxu0 %v1380_v6  ;;  %v1333_v63 = vpop.eup %1332 }
 0x43f   : > { %v783_v1 = vmul.f32 %v1333_v63, %v1321_v39 }
 0x440   : > { %1217 = vmatmul.mubr.msk.bf16.vlgmr.msra.gmra.mxu0 %vm509_vm2, %v660_v62 }
 0x441   : > { %1227 = vmatpush3.bf16.msra.mxu0 %v787_v31  ;;  %1228 = vmatprep.mubr.msk.bf16.mxu0 %vm1381_vm0, %v1380_v6 }
 0x442   : > { %v1335_v0 = vpop.eup %1334  ;;  %1238 = vmatprep.subr.bf16.mxu0 %v1380_v6 }
 0x443   : > { %v784_v2 = vmul.f32 %v1335_v0, %v1323_v41 }
 0x445   : > { %v785_v3 = vpack.c.bf16 %v784_v2, %v783_v1 }
 0x446   : > { %v1337_v7 = vpop.eup %1336 }
 0x447   : > { %v908_v9 = vmul.f32 %v1337_v7, %v1325_v43 }
 0x448   : > { %1229 = vmatmul.mubr.msk.bf16.vlgmr.msra.gmra.mxu0 %vm509_vm2, %v785_v3 }
 0x449   : > { %1240 = vmatprep.mubr.msk.bf16.mxu0 %vm1381_vm0, %v1380_v6 }
 0x469   : > { %v905_v4 = vpop.xlane.xlu1 %904 }
 0x46a   : > { %1338 = vrcp.f32 %v905_v4 }
 0x46d   : > { %v912_v5 = vpop.permute.xlu1 %911 }
 0x46e   : > { %1239 = vmatpush3.bf16.msra.mxu0 %v912_v5 }
 0x477   : > { %v1339_v8 = vpop.eup %1338 }
 0x478   : > { %v909_v10 = vmul.f32 %v1339_v8, %v1327_v49 }
 0x47a   : > { %v910_v12 = vpack.c.bf16 %v909_v10, %v908_v9 }
 0x47c   : > { %1241 = vmatmul.mubr.msk.bf16.vlgmr.msra.gmra.mxu0 %vm509_vm2, %v910_v12 }
 0x500   : > { %v701_v13 = vpop.f32.mrf.mxu0 }
 0x502   : > { %v1218_v14 = vpop.f32.mrf.mxu0 }
 0x504   : > { %v704_v15 = vpop.f32.mrf.mxu0 }
 0x505   : > { %v1290_v16 = vpack.i.bf16 %v704_v15, %v701_v13 }
 0x506   : > { %v1219_v17 = vpop.f32.mrf.mxu0 }
 0x507   : > { %1291 = vrot.lane.b32.xlu1 %v1290_v16, %s1383_s8 }
 0x508   : > { %v826_v6 = vpop.f32.mrf.mxu0 }
 0x50a   : > { %v1230_v18 = vpop.f32.mrf.mxu0 }
 0x50c   : > { %v829_v19 = vpop.f32.mrf.mxu0 }
 0x50d   : > { %v1295_v20 = vpack.i.bf16 %v829_v19, %v826_v6 }
 0x50e   : > { %v1231_v21 = vpop.f32.mrf.mxu0 }
 0x50f   : > { %1296 = vrot.lane.b32.xlu0 %v1295_v20, %s1384_s10 }
 0x53c   : > { %v951_v22 = vpop.f32.mrf.mxu0 }
 0x53e   : > { %v1242_v23 = vpop.f32.mrf.mxu0 }
 0x540   : > { %v954_v24 = vpop.f32.mrf.mxu0 }
 0x541   : > { %v1300_v25 = vpack.i.bf16 %v954_v24, %v951_v22 }
 0x542   : > { %v1243_v26 = vpop.f32.mrf.mxu0 }
 0x543   : > { %1301 = vrot.lane.b32.xlu1 %v1300_v25, %s1382_s7 }
 0x579   : > { %v1292_v27 = vpop.permute.xlu1 %1291 }
 0x57a   : > { %v1294_v29 = vunpack.i.h.bf16 %v1292_v27  ;;  %v1293_v30 = vunpack.i.l.bf16 %v1292_v27 }
 0x57c   : > { %v983_v34 = vsel %vm451_vm1, %v1535_v50, %v1294_v29  ;;  %v982_v35 = vsel %vm451_vm1, %v1533_v48, %v1293_v30 }
 0x581   : > { %v1297_v28 = vpop.permute.xlu0 %1296 }
 0x582   : > { %v1299_v32 = vunpack.i.h.bf16 %v1297_v28  ;;  %v1298_v33 = vunpack.i.l.bf16 %v1297_v28 }
 0x584   : > { %v986_v38 = vsel %vm984_vm3, %v983_v34, %v1299_v32  ;;  %v985_v39 = vsel %vm984_vm3, %v982_v35, %v1298_v33 }
 0x5b5   : > { %v1302_v11 = vpop.permute.xlu1 %1301 }
 0x5b6   : > { %v1304_v36 = vunpack.i.h.bf16 %v1302_v11  ;;  %v1303_v37 = vunpack.i.l.bf16 %v1302_v11 }
 0x5b8   : > { %v989_v40 = vsel %vm987_vm4, %v986_v38, %v1304_v36  ;;  %v988_v41 = vsel %vm987_vm4, %v985_v39, %v1303_v37 }
 0x5b9   : > { %v1178_v42 = vpack.c.bf16 %v989_v40, %v988_v41 }
 0x5bb   : > { %1179 = vst [vmem:[%s432_s14] sm:$0xff] %v1178_v42  }
 0x5bc PF: > { %s14_s19 = sadd.s32 1, %s1378_s19   ;;  %s1602_s15 = smov %s1366_s16 }
 0x5bd   : > { %p11_p10 = scmp.ge.s32.totalorder %s14_s19, 4   ;;  %s1603_s16 = smov %s1449_s24 }
 0x5be   : > { %s1604_s17 = smov %s1374_s18  ;;  %s1605_s18 = smov %s1607_s20 }
 0x5bf   :  { %13 = sbr.rel (!%p11_p10) target bundleno = 3 (0x3), region = 213 }

// kernel: roberta_cor_forward.37
= control target key start
LH: loop header
LB: loop body
LE: loop exit
PB: predicated region body
PF: predicated region fallthrough
CT: control target
= control target key end

     0   :  { %v381_v1 = vmov 0   ;;  %v37_v19 = vlaneseq  ;;  %s506_s1 = inlined_call_operand.vmem [shape: bf16[128,256], index: 1, kind: input, shape index: {}]   ;;  %s507_s0 = inlined_call_operand.vmem [shape: bf16[32,128], index: 0, kind: input, shape index: {}]   ;;  %s508_s2 = inlined_call_operand.vmem [shape: f32[1,256], index: 2, kind: input, shape index: {}]   ;;  %s509_s3 = inlined_call_operand.vmem [shape: bf16[32,256], index: 3, kind: output, shape index: {}]  }
   0x1   :  { %v339_v0 = vld [vmem:[%s506_s1 + $0x74] ss:$8 sps:$4 sm:$0xff]   ;;  %171 = vmatprep.mubr.bf16.mxu0 %v381_v1  ;;  %181 = vmatprep.mubr.bf16.mxu1 %v381_v1  ;;  %v341_v2 = vld [vmem:[%s506_s1 + $0x70] ss:$8 sps:$4 sm:$0xff]   ;;  %v342_v3 = vld [vmem:[%s506_s1 + $0x64] ss:$8 sps:$4 sm:$0xff]  }
   0x2   :  { %139 = vmatprep.subr.bf16.mxu0 %v339_v0  ;;  %322 = vmatprep.subr.bf16.mxu1 %v339_v0  ;;  %v344_v4 = vld [vmem:[%s506_s1 + $0x60] ss:$8 sps:$4 sm:$0xff]   ;;  %v345_v5 = vld [vmem:[%s506_s1 + $0x54] ss:$8 sps:$4 sm:$0xff]   ;;  %v347_v6 = vld [vmem:[%s506_s1 + $0x50] ss:$8 sps:$4 sm:$0xff]  }
   0x3   :  { %140 = vmatpush1.bf16.msra.mxu0 %v341_v2  ;;  %330 = vmatpush1.bf16.msra.mxu1 %v341_v2  ;;  %v348_v7 = vld [vmem:[%s506_s1 + $0x44] ss:$8 sps:$4 sm:$0xff]   ;;  %v350_v8 = vld [vmem:[%s506_s1 + $0x40] ss:$8 sps:$4 sm:$0xff]   ;;  %v351_v9 = vld [vmem:[%s506_s1 + $0x34] ss:$8 sps:$4 sm:$0xff]  }
   0x4   :  { %141 = vmatprep.subr.bf16.mxu0 %v342_v3  ;;  %323 = vmatprep.subr.bf16.mxu1 %v342_v3  ;;  %v353_v10 = vld [vmem:[%s506_s1 + $0x30] ss:$8 sps:$4 sm:$0xff]   ;;  %v354_v11 = vld [vmem:[%s506_s1 + $0x24] ss:$8 sps:$4 sm:$0xff]   ;;  %v356_v12 = vld [vmem:[%s506_s1 + $0x20] ss:$8 sps:$4 sm:$0xff]  }
   0x5   :  { %v357_v13 = vld [vmem:[%s506_s1 + $0x14] ss:$8 sps:$4 sm:$0xff]   ;;  %v359_v14 = vld [vmem:[%s506_s1 + $0x10] ss:$8 sps:$4 sm:$0xff]   ;;  %v360_v15 = vld [vmem:[%s506_s1 + $0x4] ss:$8 sps:$4 sm:$0xff]  }
   0x6   :  { %v362_v16 = vld [vmem:[%s506_s1] ss:$8 sps:$4 sm:$0xff]   ;;  %v38_v20 = vshrl.u32 %v37_v19, 7 }
   0x7   :  { %142 = vmatpush1.bf16.msra.mxu0 %v344_v4  ;;  %331 = vmatpush1.bf16.msra.mxu1 %v344_v4  ;;  %v363_v17 = vld [vmem:[%s507_s0] sm:$0xff]   ;;  %v364_v18 = vld [vmem:[%s507_s0 + $0x8] sm:$0xff]  }
   0x8   :  { %143 = vmatprep.subr.bf16.mxu0 %v345_v5  ;;  %324 = vmatprep.subr.bf16.mxu1 %v345_v5  ;;  %v39_v21 = vsub.s32 0, %v38_v20  ;;  %v35_v22 = vld [vmem:[%s508_s2] sm:$0x3]  ;;  %v43_v23 = vsub.s32 1, %v38_v20 }
   0xa   :  { %v40_v24 = vrot.slane %v35_v22, %v39_v21  ;;  %v44_v27 = vrot.slane %v35_v22, %v43_v23 }
   0xb   :  { %144 = vmatpush1.bf16.msra.mxu0 %v347_v6  ;;  %332 = vmatpush1.bf16.msra.mxu1 %v347_v6 }
   0xc   :  { %145 = vmatprep.subr.bf16.mxu0 %v348_v7  ;;  %325 = vmatprep.subr.bf16.mxu1 %v348_v7 }
   0xf   :  { %146 = vmatpush1.bf16.msra.mxu0 %v350_v8  ;;  %333 = vmatpush1.bf16.msra.mxu1 %v350_v8 }
  0x10   :  { %147 = vmatprep.subr.bf16.mxu0 %v351_v9  ;;  %326 = vmatprep.subr.bf16.mxu1 %v351_v9 }
  0x13   :  { %148 = vmatpush1.bf16.msra.mxu0 %v353_v10  ;;  %334 = vmatpush1.bf16.msra.mxu1 %v353_v10 }
  0x14   :  { %149 = vmatprep.subr.bf16.mxu0 %v354_v11  ;;  %327 = vmatprep.subr.bf16.mxu1 %v354_v11 }
  0x17   :  { %150 = vmatpush1.bf16.msra.mxu0 %v356_v12  ;;  %335 = vmatpush1.bf16.msra.mxu1 %v356_v12 }
  0x18   :  { %151 = vmatprep.subr.bf16.mxu0 %v357_v13  ;;  %328 = vmatprep.subr.bf16.mxu1 %v357_v13 }
  0x1b   :  { %152 = vmatpush1.bf16.msra.mxu0 %v359_v14  ;;  %336 = vmatpush1.bf16.msra.mxu1 %v359_v14 }
  0x1c   :  { %153 = vmatprep.subr.bf16.mxu0 %v360_v15  ;;  %329 = vmatprep.subr.bf16.mxu1 %v360_v15 }
  0x1f   :  { %154 = vmatpush1.bf16.msra.mxu0 %v362_v16  ;;  %337 = vmatpush1.bf16.msra.mxu1 %v362_v16 }
  0x22   :  { %172 = vmatmul.mubr.bf16.vlgmr.msra.gmra.mxu0 %v363_v17  ;;  %182 = vmatmul.mubr.bf16.vlgmr.msra.gmra.mxu1 %v364_v18 }
  0xe2   :  { %v173_v25 = vpop.f32.mrf.mxu0  ;;  %v183_v26 = vpop.f32.mrf.mxu1 }
  0xe3   :  { %v459_v28 = vadd.f32 %v173_v25, %v40_v24  ;;  %v461_v29 = vadd.f32 %v183_v26, %v40_v24 }
  0xe4   :  { %v175_v30 = vpop.f32.mrf.mxu0  ;;  %v185_v31 = vpop.f32.mrf.mxu1 }
  0xe5   :  { %v200_v32 = vmul.f32 0.044715, %v459_v28  ;;  %v204_v33 = vmul.f32 0.044715, %v461_v29  ;;  %v176_v34 = vadd.f32 %v175_v30, %v44_v27  ;;  %v465_v35 = vadd.f32 %v185_v31, %v44_v27 }
  0xe6   :  { %v177_v36 = vpop.f32.mrf.mxu0  ;;  %v187_v37 = vpop.f32.mrf.mxu1 }
  0xe7   :  { %v208_v38 = vmul.f32 %v200_v32, %v459_v28  ;;  %v212_v39 = vmul.f32 %v204_v33, %v461_v29  ;;  %v469_v40 = vadd.f32 %v177_v36, %v40_v24  ;;  %v471_v41 = vadd.f32 %v187_v37, %v40_v24 }
  0xe8   :  { %v201_v42 = vmul.f32 0.044715, %v176_v34  ;;  %v205_v43 = vmul.f32 0.044715, %v465_v35  ;;  %v179_v44 = vpop.f32.mrf.mxu0  ;;  %v189_v48 = vpop.f32.mrf.mxu1  ;;  %v192_v24 = vmul.f32 0.5, %v459_v28  ;;  %v193_v25 = vmul.f32 0.5, %v176_v34 }
  0xe9   :  { %v216_v45 = vmul.f32 %v208_v38, %v459_v28  ;;  %v220_v46 = vmul.f32 %v212_v39, %v461_v29  ;;  %v202_v47 = vmul.f32 0.044715, %v469_v40  ;;  %v206_v51 = vmul.f32 0.044715, %v471_v41 }
  0xea   :  { %v209_v49 = vmul.f32 %v201_v42, %v176_v34  ;;  %v213_v50 = vmul.f32 %v205_v43, %v465_v35  ;;  %v180_v55 = vadd.f32 %v179_v44, %v44_v27  ;;  %v190_v59 = vadd.f32 %v189_v48, %v44_v27 }
  0xeb   :  { %v224_v52 = vadd.f32 %v216_v45, %v459_v28  ;;  %v228_v53 = vadd.f32 %v220_v46, %v461_v29  ;;  %v210_v54 = vmul.f32 %v202_v47, %v469_v40  ;;  %v214_v58 = vmul.f32 %v206_v51, %v471_v41 }
  0xec   :  { %v217_v56 = vmul.f32 %v209_v49, %v176_v34  ;;  %v221_v57 = vmul.f32 %v213_v50, %v465_v35  ;;  %v203_v2 = vmul.f32 0.044715, %v180_v55  ;;  %v207_v4 = vmul.f32 0.044715, %v190_v59 }
  0xed   :  { %v232_v60 = vmul.f32 0.7978846, %v224_v52  ;;  %v236_v61 = vmul.f32 0.7978846, %v228_v53  ;;  %v218_v62 = vmul.f32 %v210_v54, %v469_v40  ;;  %v222_v1 = vmul.f32 %v214_v58, %v471_v41 }
  0xee   :  { %v225_v63 = vadd.f32 %v217_v56, %v176_v34  ;;  %v229_v0 = vadd.f32 %v221_v57, %v465_v35  ;;  %v211_v9 = vmul.f32 %v203_v2, %v180_v55  ;;  %v215_v10 = vmul.f32 %v207_v4, %v190_v59 }
  0xef   :  { %365 = vtanh.f32 %v232_v60  ;;  %v226_v3 = vadd.f32 %v218_v62, %v469_v40  ;;  %v230_v7 = vadd.f32 %v222_v1, %v471_v41  ;;  %v196_v27 = vmul.f32 0.5, %v461_v29 }
  0xf0   :  { %367 = vtanh.f32 %v236_v61  ;;  %v233_v5 = vmul.f32 0.7978846, %v225_v63  ;;  %v237_v6 = vmul.f32 0.7978846, %v229_v0  ;;  %v219_v12 = vmul.f32 %v211_v9, %v180_v55 }
  0xf1   :  { %v234_v8 = vmul.f32 0.7978846, %v226_v3  ;;  %v238_v11 = vmul.f32 0.7978846, %v230_v7  ;;  %v223_v13 = vmul.f32 %v215_v10, %v190_v59  ;;  %v197_v30 = vmul.f32 0.5, %v465_v35 }
  0xf2   :  { %369 = vtanh.f32 %v233_v5  ;;  %v227_v14 = vadd.f32 %v219_v12, %v180_v55  ;;  %v194_v29 = vmul.f32 0.5, %v469_v40  ;;  %v195_v35 = vmul.f32 0.5, %v180_v55 }
  0xf3   :  { %371 = vtanh.f32 %v237_v6  ;;  %v231_v15 = vadd.f32 %v223_v13, %v190_v59  ;;  %v198_v47 = vmul.f32 0.5, %v471_v41  ;;  %v199_v48 = vmul.f32 0.5, %v190_v59 }
  0xf4   :  { %373 = vtanh.f32 %v234_v8  ;;  %v235_v16 = vmul.f32 0.7978846, %v227_v14 }
  0xf5   :  { %375 = vtanh.f32 %v238_v11  ;;  %v239_v17 = vmul.f32 0.7978846, %v231_v15 }
  0xf6   :  { %377 = vtanh.f32 %v235_v16 }
  0xf7   :  { %379 = vtanh.f32 %v239_v17 }
  0xfc   :  { %v366_v18 = vpop.eup %365 }
  0xfd   :  { %v368_v19 = vpop.eup %367  ;;  %v248_v20 = vadd.f32 1.0, %v366_v18 }
  0xfe   :  { %v252_v22 = vadd.f32 1.0, %v368_v19 }
  0xff   :  { %v370_v21 = vpop.eup %369  ;;  %v256_v33 = vmul.f32 %v248_v20, %v192_v24 }
 0x100   :  { %v372_v23 = vpop.eup %371  ;;  %v249_v26 = vadd.f32 1.0, %v370_v21  ;;  %v260_v38 = vmul.f32 %v252_v22, %v196_v27 }
 0x101   :  { %v253_v31 = vadd.f32 1.0, %v372_v23  ;;  %v374_v32 = vpop.eup %373 }
 0x102   :  { %v257_v36 = vmul.f32 %v249_v26, %v193_v25  ;;  %v376_v37 = vpop.eup %375  ;;  %v250_v44 = vadd.f32 1.0, %v374_v32 }
 0x103   :  { %v261_v39 = vmul.f32 %v253_v31, %v197_v30  ;;  %v378_v45 = vpop.eup %377  ;;  %v254_v28 = vadd.f32 1.0, %v376_v37 }
 0x104   :  { %v318_v42 = vpack.c.bf16 %v257_v36, %v256_v33  ;;  %v380_v34 = vpop.eup %379  ;;  %v251_v46 = vadd.f32 1.0, %v378_v45  ;;  %v258_v50 = vmul.f32 %v250_v44, %v194_v29 }
 0x105   :  { %v320_v43 = vpack.c.bf16 %v261_v39, %v260_v38  ;;  %v255_v49 = vadd.f32 1.0, %v380_v34  ;;  %v262_v52 = vmul.f32 %v254_v28, %v198_v47 }
 0x106   :  { %288 = vst [vmem:[%s509_s3] sm:$0xff] %v318_v42  ;;  %v259_v51 = vmul.f32 %v251_v46, %v195_v35 }
 0x107   :  { %290 = vst [vmem:[%s509_s3 + $0x10] sm:$0xff] %v320_v43  ;;  %v263_v53 = vmul.f32 %v255_v49, %v199_v48 }
 0x108   :  { %v319_v54 = vpack.c.bf16 %v259_v51, %v258_v50 }
 0x109   :  { %v321_v56 = vpack.c.bf16 %v263_v53, %v262_v52 }
 0x10a   :  { %289 = vst [vmem:[%s509_s3 + $0x8] sm:$0xff] %v319_v54 }
 0x10b   :  { %291 = vst [vmem:[%s509_s3 + $0x18] sm:$0xff] %v321_v56 }

// kernel: roberta_cor_forward.38
= control target key start
LH: loop header
LB: loop body
LE: loop exit
PB: predicated region body
PF: predicated region fallthrough
CT: control target
= control target key end

     0   :  { %s576_s1 = inlined_call_operand.vmem [shape: bf16[256,128], index: 1, kind: input, shape index: {}]   ;;  %s577_s0 = inlined_call_operand.vmem [shape: bf16[32,256], index: 0, kind: input, shape index: {}]   ;;  %s578_s3 = inlined_call_operand.vmem [shape: bf16[32,128], index: 3, kind: input, shape index: {}]   ;;  %s579_s2 = inlined_call_operand.vmem [shape: f32[1,128], index: 2, kind: input, shape index: {}]   ;;  %s580_s4 = inlined_call_operand.vmem [shape: f32[1,128], index: 4, kind: input, shape index: {}]   ;;  %s581_s5 = inlined_call_operand.vmem [shape: f32[1,128], index: 5, kind: input, shape index: {}]   ;;  %s582_s6 = inlined_call_operand.vmem [shape: bf16[32,128], index: 6, kind: output, shape index: {}]  }
   0x1   :  { %v430_v0 = vld [vmem:[%s576_s1 + $0x78] sm:$0xff]   ;;  %v432_v2 = vld [vmem:[%s576_s1 + $0x70] sm:$0xff]   ;;  %v434_v4 = vld [vmem:[%s576_s1 + $0x68] sm:$0xff]  }
   0x2   :  { %v431_v1 = vld [vmem:[%s576_s1 + $0x38] sm:$0xff]   ;;  %386 = vmatprep.subr.bf16.mxu0 %v430_v0  ;;  %414 = vmatprep.subr.bf16.mxu1 %v430_v0  ;;  %v433_v3 = vld [vmem:[%s576_s1 + $0x30] sm:$0xff]   ;;  %v435_v5 = vld [vmem:[%s576_s1 + $0x28] sm:$0xff]  }
   0x3   :  { %387 = vmatpush3.bf16.msra.mxu0 %v431_v1  ;;  %422 = vmatpush3.bf16.msra.mxu1 %v431_v1  ;;  %v436_v6 = vld [vmem:[%s576_s1 + $0x60] sm:$0xff]   ;;  %v438_v8 = vld [vmem:[%s576_s1 + $0x58] sm:$0xff]   ;;  %v440_v10 = vld [vmem:[%s576_s1 + $0x50] sm:$0xff]  }
   0x4   :  { %388 = vmatprep.subr.bf16.mxu0 %v432_v2  ;;  %415 = vmatprep.subr.bf16.mxu1 %v432_v2  ;;  %v437_v7 = vld [vmem:[%s576_s1 + $0x20] sm:$0xff]   ;;  %v439_v9 = vld [vmem:[%s576_s1 + $0x18] sm:$0xff]   ;;  %v441_v13 = vld [vmem:[%s576_s1 + $0x10] sm:$0xff]  }
   0x5   :  { %v448_v11 = vld [vmem:[%s577_s0 + $0x4] ss:$8 sps:$4 sm:$0xff]   ;;  %v451_v12 = vld [vmem:[%s577_s0 + $0x14] ss:$8 sps:$4 sm:$0xff]   ;;  %v446_v18 = vld [vmem:[%s577_s0] ss:$8 sps:$4 sm:$0xff]  }
   0x6   :  { %v442_v14 = vld [vmem:[%s576_s1 + $0x48] sm:$0xff]   ;;  %215 = vmatprep.mubr.bf16.mxu0 %v448_v11  ;;  %223 = vmatprep.mubr.bf16.mxu1 %v451_v12  ;;  %v444_v16 = vld [vmem:[%s576_s1 + $0x40] sm:$0xff]   ;;  %v449_v19 = vld [vmem:[%s577_s0 + $0x10] ss:$8 sps:$4 sm:$0xff]  }
   0x7   :  { %389 = vmatpush3.bf16.msra.mxu0 %v433_v3  ;;  %423 = vmatpush3.bf16.msra.mxu1 %v433_v3  ;;  %v443_v15 = vld [vmem:[%s576_s1 + $0x8] sm:$0xff]   ;;  %v445_v17 = vld [vmem:[%s576_s1] sm:$0xff]  }
   0x8   :  { %390 = vmatprep.subr.bf16.mxu0 %v434_v4  ;;  %416 = vmatprep.subr.bf16.mxu1 %v434_v4  ;;  %v384_v22 = vld [vmem:[%s578_s3 + $0x8] sm:$0xff]   ;;  %v367_v23 = vld [vmem:[%s578_s3] sm:$0xff]  }
   0x9   :  { %v335_v24 = vld [vmem:[%s579_s2] ss:$0 sm:$0xff]  ;;  %v372_v29 = vunpack.c.l.bf16 %v384_v22  ;;  %v368_v30 = vunpack.c.l.bf16 %v367_v23  ;;  %v373_v37 = vunpack.c.h.bf16 %v384_v22  ;;  %v369_v38 = vunpack.c.h.bf16 %v367_v23 }
   0xb   :  { %391 = vmatpush3.bf16.msra.mxu0 %v435_v5  ;;  %424 = vmatpush3.bf16.msra.mxu1 %v435_v5 }
   0xc   :  { %392 = vmatprep.subr.bf16.mxu0 %v436_v6  ;;  %417 = vmatprep.subr.bf16.mxu1 %v436_v6 }
   0xf   :  { %393 = vmatpush3.bf16.msra.mxu0 %v437_v7  ;;  %425 = vmatpush3.bf16.msra.mxu1 %v437_v7 }
  0x10   :  { %394 = vmatprep.subr.bf16.mxu0 %v438_v8  ;;  %418 = vmatprep.subr.bf16.mxu1 %v438_v8 }
  0x13   :  { %395 = vmatpush3.bf16.msra.mxu0 %v439_v9  ;;  %426 = vmatpush3.bf16.msra.mxu1 %v439_v9 }
  0x14   :  { %396 = vmatprep.subr.bf16.mxu0 %v440_v10  ;;  %419 = vmatprep.subr.bf16.mxu1 %v440_v10 }
  0x17   :  { %397 = vmatpush3.bf16.msra.mxu0 %v441_v13  ;;  %427 = vmatpush3.bf16.msra.mxu1 %v441_v13  ;;  %v356_v13 = vld [vmem:[%s580_s4] ss:$0 sm:$0xff] }
  0x18   :  { %398 = vmatprep.subr.bf16.mxu0 %v442_v14  ;;  %420 = vmatprep.subr.bf16.mxu1 %v442_v14 }
  0x1b   :  { %399 = vmatpush3.bf16.msra.mxu0 %v443_v15  ;;  %428 = vmatpush3.bf16.msra.mxu1 %v443_v15 }
  0x1c   :  { %400 = vmatprep.subr.bf16.mxu0 %v444_v16  ;;  %421 = vmatprep.subr.bf16.mxu1 %v444_v16 }
  0x1f   :  { %401 = vmatpush3.bf16.msra.mxu0 %v445_v17  ;;  %429 = vmatpush3.bf16.msra.mxu1 %v445_v17 }
  0x22   :  { %216 = vmatmul.mubr.bf16.vlgmr.msra.gmra.mxu0 %v446_v18  ;;  %224 = vmatmul.mubr.bf16.vlgmr.msra.gmra.mxu1 %v449_v19  ;;  %v357_v18 = vld [vmem:[%s581_s5] ss:$0 sm:$0xff] }
  0xe2   :  { %v402_v20 = vpop.f32.mrf.mxu0  ;;  %v408_v21 = vpop.f32.mrf.mxu1 }
  0xe4   :  { %v403_v25 = vpop.f32.mrf.mxu0  ;;  %v409_v26 = vpop.f32.mrf.mxu1 }
  0xe5   :  { %v404_v27 = vadd.f32 %v403_v25, %v402_v20  ;;  %v410_v28 = vadd.f32 %v409_v26, %v408_v21 }
  0xe6   :  { %v405_v31 = vpop.f32.mrf.mxu0  ;;  %v411_v32 = vpop.f32.mrf.mxu1 }
  0xe7   :  { %v218_v33 = vadd.f32 %v404_v27, %v335_v24  ;;  %v226_v34 = vadd.f32 %v410_v28, %v335_v24 }
  0xe8   :  { %v406_v35 = vpop.f32.mrf.mxu0  ;;  %v412_v36 = vpop.f32.mrf.mxu1 }
  0xe9   :  { %v407_v39 = vadd.f32 %v406_v35, %v405_v31  ;;  %v413_v40 = vadd.f32 %v412_v36, %v411_v32  ;;  %v242_v41 = vadd.f32 %v372_v29, %v226_v34  ;;  %v240_v42 = vadd.f32 %v368_v30, %v218_v33 }
  0xeb   :  { %v221_v43 = vadd.f32 %v407_v39, %v335_v24  ;;  %v229_v44 = vadd.f32 %v413_v40, %v335_v24  ;;  %248 = vadd.xlane.f32.xlu1 %v242_v41  ;;  %244 = vadd.xlane.f32.xlu0 %v240_v42 }
  0xed   :  { %v243_v45 = vadd.f32 %v373_v37, %v229_v44  ;;  %v241_v46 = vadd.f32 %v369_v38, %v221_v43 }
  0xef   :  { %250 = vadd.xlane.f32.xlu1 %v243_v45  ;;  %246 = vadd.xlane.f32.xlu0 %v241_v46 }
 0x174   :  { %v249_v47 = vpop.xlane.xlu1 %248  ;;  %v245_v48 = vpop.xlane.xlu0 %244 }
 0x175   :  { %v255_v49 = vmul.f32 0.0078125, %v249_v47  ;;  %v253_v50 = vmul.f32 0.0078125, %v245_v48 }
 0x177   :  { %v257_v51 = vsub.f32 %v240_v42, %v253_v50  ;;  %v259_v54 = vsub.f32 %v242_v41, %v255_v49 }
 0x178   :  { %v251_v52 = vpop.xlane.xlu1 %250  ;;  %v247_v53 = vpop.xlane.xlu0 %246 }
 0x179   :  { %v256_v55 = vmul.f32 0.0078125, %v251_v52  ;;  %v254_v56 = vmul.f32 0.0078125, %v247_v53  ;;  %v261_v57 = vmul.f32 %v257_v51, %v257_v51  ;;  %v263_v60 = vmul.f32 %v259_v54, %v259_v54 }
 0x17b   :  { %v258_v58 = vsub.f32 %v241_v46, %v254_v56  ;;  %265 = vadd.xlane.f32.xlu0 %v261_v57  ;;  %v260_v59 = vsub.f32 %v243_v45, %v256_v55 }
 0x17d   :  { %v262_v61 = vmul.f32 %v258_v58, %v258_v58  ;;  %v264_v62 = vmul.f32 %v260_v59, %v260_v59 }
 0x17f   :  { %269 = vadd.xlane.f32.xlu0 %v263_v60  ;;  %267 = vadd.xlane.f32.xlu1 %v262_v61 }
 0x183   :  { %271 = vadd.xlane.f32.xlu1 %v264_v62 }
 0x204   :  { %v266_v63 = vpop.xlane.xlu0 %265 }
 0x205   :  { %v273_v0 = vmul.f32 0.0078125, %v266_v63 }
 0x207   :  { %v277_v1 = vadd.f32 1e-05, %v273_v0 }
 0x208   :  { %v268_v2 = vpop.xlane.xlu1 %267  ;;  %v270_v3 = vpop.xlane.xlu0 %269 }
 0x209   :  { %452 = vrsqrt.f32 %v277_v1  ;;  %v274_v4 = vmul.f32 0.0078125, %v268_v2  ;;  %v275_v5 = vmul.f32 0.0078125, %v270_v3 }
 0x20b   :  { %v278_v6 = vadd.f32 1e-05, %v274_v4  ;;  %v279_v7 = vadd.f32 1e-05, %v275_v5 }
 0x20c   :  { %v272_v8 = vpop.xlane.xlu1 %271 }
 0x20d   :  { %454 = vrsqrt.f32 %v278_v6  ;;  %v276_v9 = vmul.f32 0.0078125, %v272_v8 }
 0x20e   :  { %456 = vrsqrt.f32 %v279_v7 }
 0x20f   :  { %v280_v10 = vadd.f32 1e-05, %v276_v9 }
 0x211   :  { %458 = vrsqrt.f32 %v280_v10 }
 0x216   :  { %v453_v11 = vpop.eup %452 }
 0x217   :  { %v285_v12 = vmul.f32 %v453_v11, %v257_v51 }
 0x219   :  { %v296_v16 = vmul.f32 %v356_v13, %v285_v12 }
 0x21a   :  { %v455_v14 = vpop.eup %454 }
 0x21b   :  { %v457_v15 = vpop.eup %456  ;;  %v286_v17 = vmul.f32 %v455_v14, %v258_v58  ;;  %v307_v22 = vadd.f32 %v357_v18, %v296_v16 }
 0x21c   :  { %v287_v19 = vmul.f32 %v457_v15, %v259_v54 }
 0x21d   :  { %v297_v20 = vmul.f32 %v356_v13, %v286_v17 }
 0x21e   :  { %v459_v21 = vpop.eup %458  ;;  %v298_v24 = vmul.f32 %v356_v13, %v287_v19 }
 0x21f   :  { %v308_v23 = vadd.f32 %v357_v18, %v297_v20  ;;  %v288_v25 = vmul.f32 %v459_v21, %v260_v59 }
 0x220   :  { %v309_v28 = vadd.f32 %v357_v18, %v298_v24 }
 0x221   :  { %v377_v26 = vpack.c.bf16 %v308_v23, %v307_v22  ;;  %v299_v27 = vmul.f32 %v356_v13, %v288_v25 }
 0x223   :  { %378 = vst [vmem:[%s582_s6] sm:$0xff] %v377_v26   ;;  %v310_v29 = vadd.f32 %v357_v18, %v299_v27 }
 0x225   :  { %v382_v30 = vpack.c.bf16 %v310_v29, %v309_v28 }
 0x227   :  { %385 = vst [vmem:[%s582_s6 + $0x8] sm:$0xff] %v382_v30  }

</bundles_post_ra>
